<compile_context>
chip_gen: v7x
topology: tpu7x:2x2x1
jax: 0.10.0
libtpu: 0.0.40
codegen_flags: <defaults>
</compile_context>

<pallas_src>
import functools

import jax
import jax.numpy as jnp
from jax import lax
from jax.experimental import pallas as pl
from jax.experimental.pallas import tpu as pltpu


def _vmem_limit_bytes():
    """~7/8 of physical VMEM, capped at 112 MiB (v5e/v6e: 128 MiB, v7x: 64 MiB)."""
    try:
        cap = int(pltpu.get_tpu_info().vmem_capacity_bytes)
    except Exception:
        cap = 64 * 1024 * 1024
    return min((cap // 8) * 7, 112 * 1024 * 1024)


_VMEM_LIMIT = _vmem_limit_bytes()


# ---------------------------------------------------------------------------
# Layer 1: row-tiled matmul + bias + ReLU + MaxPool2x2 over precomputed patches
# ---------------------------------------------------------------------------
def _conv1_kernel(p0_ref, p1_ref, p2_ref, p3_ref, w_ref, b_ref, oe_ref, oo_ref,
                  *, wq, cout):
    """p{g}: (TM, 27) bf16 im2col rows for conv-output columns w == g (mod 4),
    row order (image, conv_row, quarter_col).  w: (27, cout) taps in (ky,kx,cin)
    order.  b: (1, cout) f32.  oe/oo: (TM//2, cout) bf16 pooled rows for even /
    odd pooled output columns (rows ordered (image, pooled_row, quarter_col))."""
    tm = p0_ref.shape[0]
    groups = tm // (2 * wq)
    w = w_ref[...]
    b = b_ref[...]

    def conv_wpool(pa_ref, pb_ref):
        da = jnp.dot(pa_ref[...], w, preferred_element_type=jnp.float32)
        db = jnp.dot(pb_ref[...], w, preferred_element_type=jnp.float32)
        # bias + ReLU commute with max -> apply once after the W-pool.
        return jnp.maximum(jnp.maximum(da, db) + b, 0.0)          # (TM, cout)

    def hpool(m):
        # Adjacent conv rows of one image are wq flat-rows apart; tiles are
        # aligned to 2*wq so every group holds one complete (h, h+1) pair.
        r = m.reshape(groups, 2, wq, cout)
        return jnp.maximum(r[:, 0], r[:, 1]).reshape(tm // 2, cout)

    oe_ref[...] = hpool(conv_wpool(p0_ref, p1_ref)).astype(oe_ref.dtype)
    oo_ref[...] = hpool(conv_wpool(p2_ref, p3_ref)).astype(oo_ref.dtype)


def conv1_relu_pool(p0, p1, p2, p3, wmat, bias, *, n, h, wq, cout=32):
    total_rows, kdim = p0.shape
    assert total_rows == n * h * wq
    n_ho = n * (h // 2)
    base = 2 * wq

    # Rows per grid step: bounded working set (v7x VMEM), >=2 parallel steps
    # when possible (megacore), blocks sublane-aligned and covering whole pairs.
    cap = max(1, min(4096 // base, n_ho // 2))
    mult = n_ho                                   # fallback: whole problem (always legal)
    for d in range(min(cap, n_ho), 0, -1):
        if n_ho % d == 0 and (wq * d) % 8 == 0:
            mult = d
            break
    tm = base * mult
    grid = (n_ho // mult,)

    flops = 2 * 4 * total_rows * kdim * cout
    bytes_acc = (4 * total_rows * kdim + kdim * cout + 2 * n_ho * wq * cout) * 2 + cout * 4

    kernel = functools.partial(_conv1_kernel, wq=wq, cout=cout)
    out_sds = jax.ShapeDtypeStruct((n_ho * wq, cout), jnp.bfloat16)
    in_spec = pl.BlockSpec((tm, kdim), lambda t: (t, 0))
    out_spec = pl.BlockSpec((tm // 2, cout), lambda t: (t, 0))

    return pl.pallas_call(
        kernel,
        out_shape=(out_sds, out_sds),
        grid=grid,
        in_specs=[in_spec, in_spec, in_spec, in_spec,
                  pl.BlockSpec((kdim, cout), lambda t: (0, 0)),
                  pl.BlockSpec((1, cout), lambda t: (0, 0))],
        out_specs=(out_spec, out_spec),
        compiler_params=pltpu.CompilerParams(
            dimension_semantics=("parallel",),
            vmem_limit_bytes=_VMEM_LIMIT),
        cost_estimate=pl.CostEstimate(
            flops=flops, transcendentals=0, bytes_accessed=bytes_acc),
    )(p0, p1, p2, p3, wmat, bias)


# ---------------------------------------------------------------------------
# Layer 2: fused Conv3x3(pad=1) + bias + ReLU + MaxPool2x2 (one image / step)
# ---------------------------------------------------------------------------
def _conv2_kernel(xe_ref, xo_ref, w_ref, b_ref, o_ref, *, h, wo, cin, cout):
    """xe/xo: (1, h+2, wo+1, cin) even/odd padded input columns (bf16).
    w: (9*cin, cout) taps in (ky, kx, cin) order.  b: (1, cout) f32.
    o: (1, (h//2)*wo, cout) pooled output, rows in (ho, wo) order (bf16)."""
    ho = h // 2
    xe = xe_ref[0]
    xo = xo_ref[0]
    w = w_ref[...]
    b = b_ref[...]

    def patches(kx_sources):
        cols = []
        for ky in range(3):
            for kx in range(3):
                src, off = kx_sources[kx]
                cols.append(src[ky:ky + h, off:off + wo, :])
        return jnp.concatenate(cols, axis=-1).reshape(h * wo, 9 * cin)

    # Even output columns first; ye is computed before the second patch buffer
    # is constructed to keep the two large patch tensors from both being live.
    pe = patches(((xe, 0), (xo, 0), (xe, 1)))
    ye = jnp.dot(pe, w, preferred_element_type=jnp.float32)
    po = patches(((xo, 0), (xe, 1), (xo, 1)))
    yo = jnp.dot(po, w, preferred_element_type=jnp.float32)

    yw = jnp.maximum(jnp.maximum(ye, yo) + b, 0.0)        # W-pool + bias + ReLU
    yr = yw.reshape(ho, 2, wo, cout)                       # leading-dim split only
    yp = jnp.maximum(yr[:, 0], yr[:, 1])                   # H-pool -> (ho, wo, cout)
    o_ref[0] = yp.reshape(ho * wo, cout).astype(o_ref.dtype)


def conv2_relu_pool(xe, xo, wmat, bias, cout=64):
    n, hp, we, cin = xe.shape
    h = hp - 2
    wo = we - 1
    s_out = (h // 2) * wo

    flops = 2 * n * h * (2 * wo) * (9 * cin) * cout
    bytes_acc = (2 * n * hp * we * cin + 9 * cin * cout + n * s_out * cout) * 2 + cout * 4

    kernel = functools.partial(_conv2_kernel, h=h, wo=wo, cin=cin, cout=cout)
    return pl.pallas_call(
        kernel,
        out_shape=jax.ShapeDtypeStruct((n, s_out, cout), jnp.bfloat16),
        grid=(n,),
        in_specs=[
            pl.BlockSpec((1, hp, we, cin), lambda i: (i, 0, 0, 0)),
            pl.BlockSpec((1, hp, we, cin), lambda i: (i, 0, 0, 0)),
            pl.BlockSpec((9 * cin, cout), lambda i: (0, 0)),
            pl.BlockSpec((1, cout), lambda i: (0, 0)),
        ],
        out_specs=pl.BlockSpec((1, s_out, cout), lambda i: (i, 0, 0)),
        compiler_params=pltpu.CompilerParams(
            dimension_semantics=("parallel",),
            vmem_limit_bytes=_VMEM_LIMIT),
        cost_estimate=pl.CostEstimate(
            flops=flops, transcendentals=0, bytes_accessed=bytes_acc),
    )(xe, xo, wmat, bias)


# ---------------------------------------------------------------------------
# Fused FC head: (x @ W1 + b1) -> ReLU -> [Dropout: eval identity] ->
#                (. @ w2 + b2) -> Sigmoid.  W1 is streamed from HBM once.
# ---------------------------------------------------------------------------
def _fc_head_kernel(x_ref, w1_ref, b1_ref, w2_ref, b2_ref, o_ref, acc_ref):
    k = pl.program_id(1)

    @pl.when(k == 0)
    def _():
        acc_ref[...] = jnp.zeros_like(acc_ref)

    acc_ref[...] += jnp.dot(x_ref[...], w1_ref[...],
                            preferred_element_type=jnp.float32)

    @pl.when(k == pl.num_programs(1) - 1)
    def _():
        h = jnp.maximum(acc_ref[...] + b1_ref[...], 0.0)          # FC1 bias + ReLU
        # TODO(synk): nn.Dropout(0.5) is identity in eval mode; no stochastic drop.
        # FC2 (128 -> 1) as a VPU multiply + lane reduction (no width-1 MXU pass).
        logits = jnp.sum(h * w2_ref[...], axis=-1, keepdims=True) + b2_ref[...]
        o_ref[...] = (1.0 / (1.0 + jnp.exp(-logits))).astype(o_ref.dtype)


def fc_head(x, w1t, b1, w2row, b2):
    n, feat = x.shape
    hidden = w1t.shape[1]          # 128

    # K tile: as large as the feature dim allows (fewer grid steps, bigger DMAs).
    tk = feat
    for cand in (8192, 4096, 2048, 1024, 512, 256, 128):
        if feat % cand == 0:
            tk = cand
            break

    # M tile: cover the whole batch whenever it fits, so W1 streams exactly once.
    def fits(tm_):
        step = 2 * (tm_ * tk + tk * hidden) * 2 + tm_ * hidden * 4 + tm_ * 8
        return step <= 24 * 1024 * 1024

    tm = n
    if not fits(tm):
        tm = 8
        for d in range(n, 7, -1):
            if n % d == 0 and d % 8 == 0 and fits(d):
                tm = d
                break

    grid = (n // tm, feat // tk)
    w1_reads = n // tm
    flops = 2 * n * feat * hidden + 2 * n * hidden
    bytes_acc = n * feat * 2 + w1_reads * feat * hidden * 2 + hidden * 8 + n * 4 + 8

    return pl.pallas_call(
        _fc_head_kernel,
        out_shape=jax.ShapeDtypeStruct((n, 1), jnp.float32),
        grid=grid,
        in_specs=[
            pl.BlockSpec((tm, tk), lambda i, k: (i, k)),
            pl.BlockSpec((tk, hidden), lambda i, k: (k, 0)),
            pl.BlockSpec((1, hidden), lambda i, k: (0, 0)),
            pl.BlockSpec((1, hidden), lambda i, k: (0, 0)),
            pl.BlockSpec((1, 1), lambda i, k: (0, 0)),
        ],
        out_specs=pl.BlockSpec((tm, 1), lambda i, k: (i, 0)),
        scratch_shapes=[pltpu.VMEM((tm, hidden), jnp.float32)],
        compiler_params=pltpu.CompilerParams(
            dimension_semantics=("parallel", "arbitrary"),
            vmem_limit_bytes=_VMEM_LIMIT),
        cost_estimate=pl.CostEstimate(
            flops=flops, transcendentals=n, bytes_accessed=bytes_acc),
    )(x, w1t, b1, w2row, b2)


# ---------------------------------------------------------------------------
# Parameters (PyTorch shape conventions) + one-time re-layout
# ---------------------------------------------------------------------------
def init_params(key, img_size):
    ks = jax.random.split(key, 8)
    feat = 64 * (img_size // 4) * (img_size // 4)
    s = 0.05
    return {
        "w1": jax.random.normal(ks[0], (32, 3, 3, 3), jnp.float32) * s,
        "b1": jax.random.normal(ks[1], (32,), jnp.float32) * s,
        "w2": jax.random.normal(ks[2], (64, 32, 3, 3), jnp.float32) * s,
        "b2": jax.random.normal(ks[3], (64,), jnp.float32) * s,
        "wfc1": jax.random.normal(ks[4], (128, feat), jnp.float32) * s,
        "bfc1": jax.random.normal(ks[5], (128,), jnp.float32) * s,
        "wfc2": jax.random.normal(ks[6], (1, 128), jnp.float32) * s,
        "bfc2": jax.random.normal(ks[7], (1,), jnp.float32) * s,
    }


def prepare_params(params, img_size):
    """One-time weight re-layouts so the jitted forward does no runtime transposes."""
    hf = wf = img_size // 4
    c2 = 64
    # Conv weights: (Cout, Cin, kh, kw) -> (kh*kw*Cin, Cout), matching the
    # (ky, kx, cin) patch-column order used by both conv kernels.
    wc1 = jnp.transpose(params["w1"], (2, 3, 1, 0)).reshape(9 * 3, 32).astype(jnp.bfloat16)
    wc2 = jnp.transpose(params["w2"], (2, 3, 1, 0)).reshape(9 * 32, 64).astype(jnp.bfloat16)
    bc1 = params["b1"].reshape(1, 32).astype(jnp.float32)
    bc2 = params["b2"].reshape(1, 64).astype(jnp.float32)
    # PyTorch Flatten is NCHW (c,h,w); conv2's activation flattens NHWC (h,w,c),
    # so permute FC1's input columns once and pre-transpose to (feat, 128).
    wfc1 = params["wfc1"].reshape(128, c2, hf, wf)
    wfc1 = jnp.transpose(wfc1, (2, 3, 1, 0)).reshape(hf * wf * c2, 128).astype(jnp.bfloat16)
    bfc1 = params["bfc1"].reshape(1, 128).astype(jnp.float32)
    wfc2 = params["wfc2"].reshape(1, 128).astype(jnp.float32)   # used as a VPU row
    bfc2 = params["bfc2"].reshape(1, 1).astype(jnp.float32)
    return {"wc1": wc1, "bc1": bc1, "wc2": wc2, "bc2": bc2,
            "wfc1": wfc1, "bfc1": bfc1, "wfc2": wfc2, "bfc2": bfc2}


# ---------------------------------------------------------------------------
# Forward pass (eval mode)
# ---------------------------------------------------------------------------
def simple_cnn_forward(x_nchw, p):
    n, cin, h, w = x_nchw.shape
    assert w % 16 == 0 and h % 4 == 0, (h, w)
    wq = w // 4

    # ---- conv1 im2col in XLA (input is tiny), grouped by output column mod 4.
    # Groups (0,1) pool into even output columns, (2,3) into odd ones, so conv1
    # emits the even/odd split conv2 consumes without any strided re-slicing.
    x = jnp.transpose(x_nchw, (0, 2, 3, 1)).astype(jnp.bfloat16)     # NHWC
    xp = jnp.pad(x, ((0, 0), (1, 1), (1, 1), (0, 0)))

    def patch_group(g):
        taps = []
        for ky in range(3):
            for kx in range(3):
                taps.append(xp[:, ky:ky + h, g + kx::4, :][:, :, :wq, :])
        return jnp.concatenate(taps, axis=-1).reshape(n * h * wq, 9 * cin)

    p0, p1, p2, p3 = (patch_group(g) for g in range(4))
    y_even, y_odd = conv1_relu_pool(p0, p1, p2, p3, p["wc1"], p["bc1"],
                                    n=n, h=h, wq=wq)                 # (N*Ho1*Wq, 32) x2
    ho1 = h // 2
    y_even = y_even.reshape(n, ho1, wq, 32)
    y_odd = y_odd.reshape(n, ho1, wq, 32)

    # ---- conv1 -> conv2 handoff: producer already split columns; only halo pads.
    xe2 = jnp.pad(y_odd, ((0, 0), (1, 1), (1, 0), (0, 0)))           # even padded cols
    xo2 = jnp.pad(y_even, ((0, 0), (1, 1), (0, 1), (0, 0)))          # odd padded cols
    feats = conv2_relu_pool(xe2, xo2, p["wc2"], p["bc2"])            # (N, Ho2*Wo2, 64)

    # ---- FC head (Flatten in NHWC order; FC1 columns were pre-permuted to match).
    xf = feats.reshape(n, -1)
    return fc_head(xf, p["wfc1"], p["bfc1"], p["wfc2"], p["bfc2"])   # (N, 1)


# ---------------------------------------------------------------------------
# Pure-JAX reference (f32) for a correctness sanity check
# ---------------------------------------------------------------------------
def _reference_forward(x_nchw, params):
    def conv(x, w, b):
        y = lax.conv_general_dilated(x, w, (1, 1), ((1, 1), (1, 1)),
                                     dimension_numbers=("NCHW", "OIHW", "NCHW"))
        return jnp.maximum(y + b[None, :, None, None], 0.0)

    def pool(x):
        nn_, c, hh, ww = x.shape
        return x.reshape(nn_, c, hh // 2, 2, ww // 2, 2).max(axis=(3, 5))

    x = pool(conv(x_nchw, params["w1"], params["b1"]))
    x = pool(conv(x, params["w2"], params["b2"]))
    x = x.reshape(x.shape[0], -1)
    hdn = jnp.maximum(x @ params["wfc1"].T + params["bfc1"], 0.0)
    logits = hdn @ params["wfc2"].T + params["bfc2"]          # Dropout = identity (eval)
    return jax.nn.sigmoid(logits)


if __name__ == "__main__":
    IMG = 16      # module default is 128; small spatial size for the self-test
    BATCH = 2

    key = jax.random.PRNGKey(0)
    kx, kp = jax.random.split(key)
    x = jax.random.normal(kx, (BATCH, 3, IMG, IMG), jnp.float32)    # NCHW, Cin=3
    params = init_params(kp, IMG)
    prepped = prepare_params(params, IMG)     # one-time weight re-layout (not per call)

    fwd = jax.jit(simple_cnn_forward)
    out = jax.block_until_ready(fwd(x, prepped))

    ref = _reference_forward(x, params)
    assert out.shape == (BATCH, 1), out.shape
    assert bool(jnp.all((out >= 0.0) & (out <= 1.0))), "sigmoid range violated"
    assert bool(jnp.max(jnp.abs(out - jnp.asarray(ref))) < 3e-2), (out, ref)
    print("KERNEL_OK")
</pallas_src>

<mosaic_0001>
module attributes {stable_mosaic.version = 11 : i64} {
  func.func @_conv1_kernel(%arg0: i32, %arg1: memref<64x27xbf16, #tpu.memory_space<vmem>>, %arg2: memref<64x27xbf16, #tpu.memory_space<vmem>>, %arg3: memref<64x27xbf16, #tpu.memory_space<vmem>>, %arg4: memref<64x27xbf16, #tpu.memory_space<vmem>>, %arg5: memref<27x32xbf16, #tpu.memory_space<vmem>>, %arg6: memref<1x32xf32, #tpu.memory_space<vmem>>, %arg7: memref<32x32xbf16, #tpu.memory_space<vmem>>, %arg8: memref<32x32xbf16, #tpu.memory_space<vmem>>) attributes {dimension_semantics = [#tpu.dimension_semantics<parallel>], iteration_bounds = array<i64: 2>, scalar_prefetch = 0 : i64, scratch_operands = 0 : i64, tpu.core_type = #tpu.core_type<tc>, window_params = [{transform_indices = @transform_0, window_bounds = array<i64: 64, 27>}, {transform_indices = @transform_1, window_bounds = array<i64: 64, 27>}, {transform_indices = @transform_2, window_bounds = array<i64: 64, 27>}, {transform_indices = @transform_3, window_bounds = array<i64: 64, 27>}, {pipeline_mode = #tpu.pipeline_mode<synchronous>, transform_indices = @transform_4, window_bounds = array<i64: 27, 32>}, {pipeline_mode = #tpu.pipeline_mode<synchronous>, transform_indices = @transform_5, window_bounds = array<i64: 1, 32>}, {transform_indices = @transform_6, window_bounds = array<i64: 32, 32>}, {transform_indices = @transform_7, window_bounds = array<i64: 32, 32>}]} {
    %c0 = arith.constant 0 : index
    %c0_0 = arith.constant 0 : index
    %0 = vector.load %arg5[%c0, %c0_0] : memref<27x32xbf16, #tpu.memory_space<vmem>>, vector<27x32xbf16>
    %c0_1 = arith.constant 0 : index
    %c0_2 = arith.constant 0 : index
    %1 = vector.load %arg6[%c0_1, %c0_2] : memref<1x32xf32, #tpu.memory_space<vmem>>, vector<1x32xf32>
    %c0_3 = arith.constant 0 : index
    %c0_4 = arith.constant 0 : index
    %2 = vector.load %arg1[%c0_3, %c0_4] : memref<64x27xbf16, #tpu.memory_space<vmem>>, vector<64x27xbf16>
    %cst = arith.constant dense<0.000000e+00> : vector<64x32xf32>
    %3 = tpu.matmul %2, %0, %cst {dimension_numbers = #tpu.dot_dimension_numbers<[1], [0], [0], [1], [0, 0, 1, 1], [], []>} : vector<64x27xbf16>, vector<27x32xbf16>, vector<64x32xf32> -> vector<64x32xf32>
    %c0_5 = arith.constant 0 : index
    %c0_6 = arith.constant 0 : index
    %4 = vector.load %arg2[%c0_5, %c0_6] : memref<64x27xbf16, #tpu.memory_space<vmem>>, vector<64x27xbf16>
    %cst_7 = arith.constant dense<0.000000e+00> : vector<64x32xf32>
    %5 = tpu.matmul %4, %0, %cst_7 {dimension_numbers = #tpu.dot_dimension_numbers<[1], [0], [0], [1], [0, 0, 1, 1], [], []>} : vector<64x27xbf16>, vector<27x32xbf16>, vector<64x32xf32> -> vector<64x32xf32>
    %6 = arith.maximumf %3, %5 : vector<64x32xf32>
    %7 = vector.broadcast %1 : vector<1x32xf32> to vector<64x32xf32>
    %8 = arith.addf %6, %7 : vector<64x32xf32>
    %cst_8 = arith.constant 0.000000e+00 : f32
    %9 = vector.broadcast %cst_8 : f32 to vector<64x32xf32>
    %10 = arith.maximumf %8, %9 : vector<64x32xf32>
    %11 = vector.shape_cast %10 : vector<64x32xf32> to vector<8x2x4x32xf32>
    %12 = vector.extract_strided_slice %11 {offsets = [0, 0, 0, 0], sizes = [8, 1, 4, 32], strides = [1, 1, 1, 1]} : vector<8x2x4x32xf32> to vector<8x1x4x32xf32>
    %13 = vector.shape_cast %12 : vector<8x1x4x32xf32> to vector<8x4x32xf32>
    %14 = vector.extract_strided_slice %11 {offsets = [0, 1, 0, 0], sizes = [8, 1, 4, 32], strides = [1, 1, 1, 1]} : vector<8x2x4x32xf32> to vector<8x1x4x32xf32>
    %15 = vector.shape_cast %14 : vector<8x1x4x32xf32> to vector<8x4x32xf32>
    %16 = arith.maximumf %13, %15 : vector<8x4x32xf32>
    %17 = vector.shape_cast %16 : vector<8x4x32xf32> to vector<32x32xf32>
    %18 = arith.truncf %17 : vector<32x32xf32> to vector<32x32xbf16>
    %c0_9 = arith.constant 0 : index
    %c0_10 = arith.constant 0 : index
    %19 = vector.load %arg7[%c0_9, %c0_10] : memref<32x32xbf16, #tpu.memory_space<vmem>>, vector<32x32xbf16>
    tpu.vector_store %arg7[%c0_9, %c0_10], %18 {strides = array<i32>} : memref<32x32xbf16, #tpu.memory_space<vmem>>, vector<32x32xbf16>,
    %c0_11 = arith.constant 0 : index
    %c0_12 = arith.constant 0 : index
    %20 = vector.load %arg3[%c0_11, %c0_12] : memref<64x27xbf16, #tpu.memory_space<vmem>>, vector<64x27xbf16>
    %cst_13 = arith.constant dense<0.000000e+00> : vector<64x32xf32>
    %21 = tpu.matmul %20, %0, %cst_13 {dimension_numbers = #tpu.dot_dimension_numbers<[1], [0], [0], [1], [0, 0, 1, 1], [], []>} : vector<64x27xbf16>, vector<27x32xbf16>, vector<64x32xf32> -> vector<64x32xf32>
    %c0_14 = arith.constant 0 : index
    %c0_15 = arith.constant 0 : index
    %22 = vector.load %arg4[%c0_14, %c0_15] : memref<64x27xbf16, #tpu.memory_space<vmem>>, vector<64x27xbf16>
    %cst_16 = arith.constant dense<0.000000e+00> : vector<64x32xf32>
    %23 = tpu.matmul %22, %0, %cst_16 {dimension_numbers = #tpu.dot_dimension_numbers<[1], [0], [0], [1], [0, 0, 1, 1], [], []>} : vector<64x27xbf16>, vector<27x32xbf16>, vector<64x32xf32> -> vector<64x32xf32>
    %24 = arith.maximumf %21, %23 : vector<64x32xf32>
    %25 = vector.broadcast %1 : vector<1x32xf32> to vector<64x32xf32>
    %26 = arith.addf %24, %25 : vector<64x32xf32>
    %cst_17 = arith.constant 0.000000e+00 : f32
    %27 = vector.broadcast %cst_17 : f32 to vector<64x32xf32>
    %28 = arith.maximumf %26, %27 : vector<64x32xf32>
    %29 = vector.shape_cast %28 : vector<64x32xf32> to vector<8x2x4x32xf32>
    %30 = vector.extract_strided_slice %29 {offsets = [0, 0, 0, 0], sizes = [8, 1, 4, 32], strides = [1, 1, 1, 1]} : vector<8x2x4x32xf32> to vector<8x1x4x32xf32>
    %31 = vector.shape_cast %30 : vector<8x1x4x32xf32> to vector<8x4x32xf32>
    %32 = vector.extract_strided_slice %29 {offsets = [0, 1, 0, 0], sizes = [8, 1, 4, 32], strides = [1, 1, 1, 1]} : vector<8x2x4x32xf32> to vector<8x1x4x32xf32>
    %33 = vector.shape_cast %32 : vector<8x1x4x32xf32> to vector<8x4x32xf32>
    %34 = arith.maximumf %31, %33 : vector<8x4x32xf32>
    %35 = vector.shape_cast %34 : vector<8x4x32xf32> to vector<32x32xf32>
    %36 = arith.truncf %35 : vector<32x32xf32> to vector<32x32xbf16>
    %c0_18 = arith.constant 0 : index
    %c0_19 = arith.constant 0 : index
    %37 = vector.load %arg8[%c0_18, %c0_19] : memref<32x32xbf16, #tpu.memory_space<vmem>>, vector<32x32xbf16>
    tpu.vector_store %arg8[%c0_18, %c0_19], %36 {strides = array<i32>} : memref<32x32xbf16, #tpu.memory_space<vmem>>, vector<32x32xbf16>,
    return
  }
  func.func @transform_0(%arg0: i32) -> (i32, i32) {
    %c0_i32 = arith.constant 0 : i32
    %c0_i32_0 = arith.constant 0 : i32
    return %arg0, %c0_i32 : i32, i32
  }
  func.func @transform_1(%arg0: i32) -> (i32, i32) {
    %c0_i32 = arith.constant 0 : i32
    %c0_i32_0 = arith.constant 0 : i32
    return %arg0, %c0_i32 : i32, i32
  }
  func.func @transform_2(%arg0: i32) -> (i32, i32) {
    %c0_i32 = arith.constant 0 : i32
    %c0_i32_0 = arith.constant 0 : i32
    return %arg0, %c0_i32 : i32, i32
  }
  func.func @transform_3(%arg0: i32) -> (i32, i32) {
    %c0_i32 = arith.constant 0 : i32
    %c0_i32_0 = arith.constant 0 : i32
    return %arg0, %c0_i32 : i32, i32
  }
  func.func @transform_4(%arg0: i32) -> (i32, i32) {
    %c0_i32 = arith.constant 0 : i32
    %c0_i32_0 = arith.constant 0 : i32
    %c0_i32_1 = arith.constant 0 : i32
    return %c0_i32, %c0_i32_0 : i32, i32
  }
  func.func @transform_5(%arg0: i32) -> (i32, i32) {
    %c0_i32 = arith.constant 0 : i32
    %c0_i32_0 = arith.constant 0 : i32
    %c0_i32_1 = arith.constant 0 : i32
    return %c0_i32, %c0_i32_0 : i32, i32
  }
  func.func @transform_6(%arg0: i32) -> (i32, i32) {
    %c0_i32 = arith.constant 0 : i32
    %c0_i32_0 = arith.constant 0 : i32
    return %arg0, %c0_i32 : i32, i32
  }
  func.func @transform_7(%arg0: i32) -> (i32, i32) {
    %c0_i32 = arith.constant 0 : i32
    %c0_i32_0 = arith.constant 0 : i32
    return %arg0, %c0_i32 : i32, i32
  }
}

module attributes {stable_mosaic.version = 11 : i64} {
  func.func @_conv2_kernel(%arg0: i32, %arg1: memref<1x10x5x32xbf16, #tpu.memory_space<vmem>>, %arg2: memref<1x10x5x32xbf16, #tpu.memory_space<vmem>>, %arg3: memref<288x64xbf16, #tpu.memory_space<vmem>>, %arg4: memref<1x64xf32, #tpu.memory_space<vmem>>, %arg5: memref<1x16x64xbf16, #tpu.memory_space<vmem>>) attributes {dimension_semantics = [#tpu.dimension_semantics<parallel>], iteration_bounds = array<i64: 2>, scalar_prefetch = 0 : i64, scratch_operands = 0 : i64, tpu.core_type = #tpu.core_type<tc>, window_params = [{transform_indices = @transform_0, window_bounds = array<i64: 1, 10, 5, 32>}, {transform_indices = @transform_1, window_bounds = array<i64: 1, 10, 5, 32>}, {pipeline_mode = #tpu.pipeline_mode<synchronous>, transform_indices = @transform_2, window_bounds = array<i64: 288, 64>}, {pipeline_mode = #tpu.pipeline_mode<synchronous>, transform_indices = @transform_3, window_bounds = array<i64: 1, 64>}, {transform_indices = @transform_4, window_bounds = array<i64: 1, 16, 64>}]} {
    %c0 = arith.constant 0 : index
    %c0_0 = arith.constant 0 : index
    %c0_1 = arith.constant 0 : index
    %c0_2 = arith.constant 0 : index
    %0 = vector.load %arg1[%c0, %c0_0, %c0_1, %c0_2] : memref<1x10x5x32xbf16, #tpu.memory_space<vmem>>, vector<1x10x5x32xbf16>
    %1 = vector.shape_cast %0 : vector<1x10x5x32xbf16> to vector<10x5x32xbf16>
    %c0_3 = arith.constant 0 : index
    %c0_4 = arith.constant 0 : index
    %c0_5 = arith.constant 0 : index
    %c0_6 = arith.constant 0 : index
    %2 = vector.load %arg2[%c0_3, %c0_4, %c0_5, %c0_6] : memref<1x10x5x32xbf16, #tpu.memory_space<vmem>>, vector<1x10x5x32xbf16>
    %3 = vector.shape_cast %2 : vector<1x10x5x32xbf16> to vector<10x5x32xbf16>
    %c0_7 = arith.constant 0 : index
    %c0_8 = arith.constant 0 : index
    %4 = vector.load %arg3[%c0_7, %c0_8] : memref<288x64xbf16, #tpu.memory_space<vmem>>, vector<288x64xbf16>
    %c0_9 = arith.constant 0 : index
    %c0_10 = arith.constant 0 : index
    %5 = vector.load %arg4[%c0_9, %c0_10] : memref<1x64xf32, #tpu.memory_space<vmem>>, vector<1x64xf32>
    %6 = vector.extract_strided_slice %1 {offsets = [0, 0, 0], sizes = [8, 4, 32], strides = [1, 1, 1]} : vector<10x5x32xbf16> to vector<8x4x32xbf16>
    %7 = vector.extract_strided_slice %3 {offsets = [0, 0, 0], sizes = [8, 4, 32], strides = [1, 1, 1]} : vector<10x5x32xbf16> to vector<8x4x32xbf16>
    %8 = vector.extract_strided_slice %1 {offsets = [0, 1, 0], sizes = [8, 4, 32], strides = [1, 1, 1]} : vector<10x5x32xbf16> to vector<8x4x32xbf16>
    %9 = vector.extract_strided_slice %1 {offsets = [1, 0, 0], sizes = [8, 4, 32], strides = [1, 1, 1]} : vector<10x5x32xbf16> to vector<8x4x32xbf16>
    %10 = vector.extract_strided_slice %3 {offsets = [1, 0, 0], sizes = [8, 4, 32], strides = [1, 1, 1]} : vector<10x5x32xbf16> to vector<8x4x32xbf16>
    %11 = vector.extract_strided_slice %1 {offsets = [1, 1, 0], sizes = [8, 4, 32], strides = [1, 1, 1]} : vector<10x5x32xbf16> to vector<8x4x32xbf16>
    %12 = vector.extract_strided_slice %1 {offsets = [2, 0, 0], sizes = [8, 4, 32], strides = [1, 1, 1]} : vector<10x5x32xbf16> to vector<8x4x32xbf16>
    %13 = vector.extract_strided_slice %3 {offsets = [2, 0, 0], sizes = [8, 4, 32], strides = [1, 1, 1]} : vector<10x5x32xbf16> to vector<8x4x32xbf16>
    %14 = vector.extract_strided_slice %1 {offsets = [2, 1, 0], sizes = [8, 4, 32], strides = [1, 1, 1]} : vector<10x5x32xbf16> to vector<8x4x32xbf16>
    %15 = tpu.concatenate %6, %7, %8, %9, %10, %11, %12, %13, %14 in 2 : vector<8x4x32xbf16>, vector<8x4x32xbf16>, vector<8x4x32xbf16>, vector<8x4x32xbf16>, vector<8x4x32xbf16>, vector<8x4x32xbf16>, vector<8x4x32xbf16>, vector<8x4x32xbf16>, vector<8x4x32xbf16> -> vector<8x4x288xbf16>
    %16 = vector.shape_cast %15 : vector<8x4x288xbf16> to vector<32x288xbf16>
    %cst = arith.constant dense<0.000000e+00> : vector<32x64xf32>
    %17 = tpu.matmul %16, %4, %cst {dimension_numbers = #tpu.dot_dimension_numbers<[1], [0], [0], [1], [0, 0, 1, 1], [], []>} : vector<32x288xbf16>, vector<288x64xbf16>, vector<32x64xf32> -> vector<32x64xf32>
    %18 = vector.extract_strided_slice %3 {offsets = [0, 0, 0], sizes = [8, 4, 32], strides = [1, 1, 1]} : vector<10x5x32xbf16> to vector<8x4x32xbf16>
    %19 = vector.extract_strided_slice %1 {offsets = [0, 1, 0], sizes = [8, 4, 32], strides = [1, 1, 1]} : vector<10x5x32xbf16> to vector<8x4x32xbf16>
    %20 = vector.extract_strided_slice %3 {offsets = [0, 1, 0], sizes = [8, 4, 32], strides = [1, 1, 1]} : vector<10x5x32xbf16> to vector<8x4x32xbf16>
    %21 = vector.extract_strided_slice %3 {offsets = [1, 0, 0], sizes = [8, 4, 32], strides = [1, 1, 1]} : vector<10x5x32xbf16> to vector<8x4x32xbf16>
    %22 = vector.extract_strided_slice %1 {offsets = [1, 1, 0], sizes = [8, 4, 32], strides = [1, 1, 1]} : vector<10x5x32xbf16> to vector<8x4x32xbf16>
    %23 = vector.extract_strided_slice %3 {offsets = [1, 1, 0], sizes = [8, 4, 32], strides = [1, 1, 1]} : vector<10x5x32xbf16> to vector<8x4x32xbf16>
    %24 = vector.extract_strided_slice %3 {offsets = [2, 0, 0], sizes = [8, 4, 32], strides = [1, 1, 1]} : vector<10x5x32xbf16> to vector<8x4x32xbf16>
    %25 = vector.extract_strided_slice %1 {offsets = [2, 1, 0], sizes = [8, 4, 32], strides = [1, 1, 1]} : vector<10x5x32xbf16> to vector<8x4x32xbf16>
    %26 = vector.extract_strided_slice %3 {offsets = [2, 1, 0], sizes = [8, 4, 32], strides = [1, 1, 1]} : vector<10x5x32xbf16> to vector<8x4x32xbf16>
    %27 = tpu.concatenate %18, %19, %20, %21, %22, %23, %24, %25, %26 in 2 : vector<8x4x32xbf16>, vector<8x4x32xbf16>, vector<8x4x32xbf16>, vector<8x4x32xbf16>, vector<8x4x32xbf16>, vector<8x4x32xbf16>, vector<8x4x32xbf16>, vector<8x4x32xbf16>, vector<8x4x32xbf16> -> vector<8x4x288xbf16>
    %28 = vector.shape_cast %27 : vector<8x4x288xbf16> to vector<32x288xbf16>
    %cst_11 = arith.constant dense<0.000000e+00> : vector<32x64xf32>
    %29 = tpu.matmul %28, %4, %cst_11 {dimension_numbers = #tpu.dot_dimension_numbers<[1], [0], [0], [1], [0, 0, 1, 1], [], []>} : vector<32x288xbf16>, vector<288x64xbf16>, vector<32x64xf32> -> vector<32x64xf32>
    %30 = arith.maximumf %17, %29 : vector<32x64xf32>
    %31 = vector.broadcast %5 : vector<1x64xf32> to vector<32x64xf32>
    %32 = arith.addf %30, %31 : vector<32x64xf32>
    %cst_12 = arith.constant 0.000000e+00 : f32
    %33 = vector.broadcast %cst_12 : f32 to vector<32x64xf32>
    %34 = arith.maximumf %32, %33 : vector<32x64xf32>
    %35 = vector.shape_cast %34 : vector<32x64xf32> to vector<4x2x4x64xf32>
    %36 = vector.extract_strided_slice %35 {offsets = [0, 0, 0, 0], sizes = [4, 1, 4, 64], strides = [1, 1, 1, 1]} : vector<4x2x4x64xf32> to vector<4x1x4x64xf32>
    %37 = vector.shape_cast %36 : vector<4x1x4x64xf32> to vector<4x4x64xf32>
    %38 = vector.extract_strided_slice %35 {offsets = [0, 1, 0, 0], sizes = [4, 1, 4, 64], strides = [1, 1, 1, 1]} : vector<4x2x4x64xf32> to vector<4x1x4x64xf32>
    %39 = vector.shape_cast %38 : vector<4x1x4x64xf32> to vector<4x4x64xf32>
    %40 = arith.maximumf %37, %39 : vector<4x4x64xf32>
    %41 = vector.shape_cast %40 : vector<4x4x64xf32> to vector<16x64xf32>
    %42 = arith.truncf %41 : vector<16x64xf32> to vector<16x64xbf16>
    %c0_13 = arith.constant 0 : index
    %c0_14 = arith.constant 0 : index
    %c0_15 = arith.constant 0 : index
    %43 = vector.load %arg5[%c0_13, %c0_14, %c0_15] : memref<1x16x64xbf16, #tpu.memory_space<vmem>>, vector<1x16x64xbf16>
    %44 = vector.shape_cast %43 : vector<1x16x64xbf16> to vector<16x64xbf16>
    %45 = vector.shape_cast %42 : vector<16x64xbf16> to vector<1x16x64xbf16>
    tpu.vector_store %arg5[%c0_13, %c0_14, %c0_15], %45 {strides = array<i32>} : memref<1x16x64xbf16, #tpu.memory_space<vmem>>, vector<1x16x64xbf16>,
    return
  }
  func.func @transform_0(%arg0: i32) -> (i32, i32, i32, i32) {
    %c0_i32 = arith.constant 0 : i32
    %c0_i32_0 = arith.constant 0 : i32
    %c0_i32_1 = arith.constant 0 : i32
    %c0_i32_2 = arith.constant 0 : i32
    return %arg0, %c0_i32, %c0_i32_0, %c0_i32_1 : i32, i32, i32, i32
  }
  func.func @transform_1(%arg0: i32) -> (i32, i32, i32, i32) {
    %c0_i32 = arith.constant 0 : i32
    %c0_i32_0 = arith.constant 0 : i32
    %c0_i32_1 = arith.constant 0 : i32
    %c0_i32_2 = arith.constant 0 : i32
    return %arg0, %c0_i32, %c0_i32_0, %c0_i32_1 : i32, i32, i32, i32
  }
  func.func @transform_2(%arg0: i32) -> (i32, i32) {
    %c0_i32 = arith.constant 0 : i32
    %c0_i32_0 = arith.constant 0 : i32
    %c0_i32_1 = arith.constant 0 : i32
    return %c0_i32, %c0_i32_0 : i32, i32
  }
  func.func @transform_3(%arg0: i32) -> (i32, i32) {
    %c0_i32 = arith.constant 0 : i32
    %c0_i32_0 = arith.constant 0 : i32
    %c0_i32_1 = arith.constant 0 : i32
    return %c0_i32, %c0_i32_0 : i32, i32
  }
  func.func @transform_4(%arg0: i32) -> (i32, i32, i32) {
    %c0_i32 = arith.constant 0 : i32
    %c0_i32_0 = arith.constant 0 : i32
    %c0_i32_1 = arith.constant 0 : i32
    return %arg0, %c0_i32, %c0_i32_0 : i32, i32, i32
  }
}

module attributes {stable_mosaic.version = 11 : i64} {
  func.func @_fc_head_kernel(%arg0: i32, %arg1: i32, %arg2: memref<2x1024xbf16, #tpu.memory_space<vmem>>, %arg3: memref<1024x128xbf16, #tpu.memory_space<vmem>>, %arg4: memref<1x128xf32, #tpu.memory_space<vmem>>, %arg5: memref<1x128xf32, #tpu.memory_space<vmem>>, %arg6: memref<1x1xf32, #tpu.memory_space<vmem>>, %arg7: memref<2x1xf32, #tpu.memory_space<vmem>>, %arg8: memref<2x128xf32, #tpu.memory_space<vmem>>) attributes {dimension_semantics = [#tpu.dimension_semantics<parallel>, #tpu.dimension_semantics<arbitrary>], iteration_bounds = array<i64: 1, 1>, scalar_prefetch = 0 : i64, scratch_operands = 1 : i64, tpu.core_type = #tpu.core_type<tc>, window_params = [{transform_indices = @transform_0, window_bounds = array<i64: 2, 1024>}, {transform_indices = @transform_1, window_bounds = array<i64: 1024, 128>}, {pipeline_mode = #tpu.pipeline_mode<synchronous>, transform_indices = @transform_2, window_bounds = array<i64: 1, 128>}, {pipeline_mode = #tpu.pipeline_mode<synchronous>, transform_indices = @transform_3, window_bounds = array<i64: 1, 128>}, {pipeline_mode = #tpu.pipeline_mode<synchronous>, transform_indices = @transform_4, window_bounds = array<i64: 1, 1>}, {transform_indices = @transform_5, window_bounds = array<i64: 2, 1>}]} {
    %c0_i32 = arith.constant 0 : i32
    %0 = arith.cmpi eq, %arg1, %c0_i32 : i32
    %1 = arith.extui %0 : i1 to i32
    %c0_i32_0 = arith.constant 0 : i32
    %2 = arith.cmpi ne, %1, %c0_i32_0 : i32
    scf.if %2 {
      %cst_10 = arith.constant 0.000000e+00 : f32
      %12 = vector.broadcast %cst_10 : f32 to vector<2x128xf32>
      %c0_11 = arith.constant 0 : index
      %c0_12 = arith.constant 0 : index
      %13 = vector.load %arg8[%c0_11, %c0_12] : memref<2x128xf32, #tpu.memory_space<vmem>>, vector<2x128xf32>
      tpu.vector_store %arg8[%c0_11, %c0_12], %12 {strides = array<i32>} : memref<2x128xf32, #tpu.memory_space<vmem>>, vector<2x128xf32>,
    } else {
    }
    %c0 = arith.constant 0 : index
    %c0_1 = arith.constant 0 : index
    %3 = vector.load %arg8[%c0, %c0_1] : memref<2x128xf32, #tpu.memory_space<vmem>>, vector<2x128xf32>
    %c0_2 = arith.constant 0 : index
    %c0_3 = arith.constant 0 : index
    %4 = vector.load %arg2[%c0_2, %c0_3] : memref<2x1024xbf16, #tpu.memory_space<vmem>>, vector<2x1024xbf16>
    %c0_4 = arith.constant 0 : index
    %c0_5 = arith.constant 0 : index
    %5 = vector.load %arg3[%c0_4, %c0_5] : memref<1024x128xbf16, #tpu.memory_space<vmem>>, vector<1024x128xbf16>
    %cst = arith.constant dense<0.000000e+00> : vector<2x128xf32>
    %6 = tpu.matmul %4, %5, %cst {dimension_numbers = #tpu.dot_dimension_numbers<[1], [0], [0], [1], [0, 0, 1, 1], [], []>} : vector<2x1024xbf16>, vector<1024x128xbf16>, vector<2x128xf32> -> vector<2x128xf32>
    %7 = arith.addf %3, %6 : vector<2x128xf32>
    %c0_6 = arith.constant 0 : index
    %c0_7 = arith.constant 0 : index
    %8 = vector.load %arg8[%c0_6, %c0_7] : memref<2x128xf32, #tpu.memory_space<vmem>>, vector<2x128xf32>
    tpu.vector_store %arg8[%c0_6, %c0_7], %7 {strides = array<i32>} : memref<2x128xf32, #tpu.memory_space<vmem>>, vector<2x128xf32>,
    %c0_i32_8 = arith.constant 0 : i32
    %9 = arith.cmpi eq, %arg1, %c0_i32_8 : i32
    %10 = arith.extui %9 : i1 to i32
    %c0_i32_9 = arith.constant 0 : i32
    %11 = arith.cmpi ne, %10, %c0_i32_9 : i32
    scf.if %11 {
      %c0_10 = arith.constant 0 : index
      %c0_11 = arith.constant 0 : index
      %12 = vector.load %arg8[%c0_10, %c0_11] : memref<2x128xf32, #tpu.memory_space<vmem>>, vector<2x128xf32>
      %c0_12 = arith.constant 0 : index
      %c0_13 = arith.constant 0 : index
      %13 = vector.load %arg4[%c0_12, %c0_13] : memref<1x128xf32, #tpu.memory_space<vmem>>, vector<1x128xf32>
      %14 = vector.broadcast %13 : vector<1x128xf32> to vector<2x128xf32>
      %15 = arith.addf %12, %14 : vector<2x128xf32>
      %cst_14 = arith.constant 0.000000e+00 : f32
      %16 = vector.broadcast %cst_14 : f32 to vector<2x128xf32>
      %17 = arith.maximumf %15, %16 : vector<2x128xf32>
      %c0_15 = arith.constant 0 : index
      %c0_16 = arith.constant 0 : index
      %18 = vector.load %arg5[%c0_15, %c0_16] : memref<1x128xf32, #tpu.memory_space<vmem>>, vector<1x128xf32>
      %19 = vector.broadcast %18 : vector<1x128xf32> to vector<2x128xf32>
      %20 = arith.mulf %17, %19 : vector<2x128xf32>
      %cst_17 = arith.constant dense<0.000000e+00> : vector<2xf32>
      %21 = vector.multi_reduction <add>, %20, %cst_17 [1] : vector<2x128xf32> to vector<2xf32>
      %22 = vector.shape_cast %21 : vector<2xf32> to vector<2x1xf32>
      %c0_18 = arith.constant 0 : index
      %c0_19 = arith.constant 0 : index
      %23 = vector.load %arg6[%c0_18, %c0_19] : memref<1x1xf32, #tpu.memory_space<vmem>>, vector<1x1xf32>
      %24 = vector.broadcast %23 : vector<1x1xf32> to vector<2x1xf32>
      %25 = arith.addf %22, %24 : vector<2x1xf32>
      %cst_20 = arith.constant 0.000000e+00 : f32
      %26 = vector.broadcast %cst_20 : f32 to vector<2x1xf32>
      %27 = arith.subf %26, %25 : vector<2x1xf32>
      %28 = math.exp %27 : vector<2x1xf32>
      %cst_21 = arith.constant 1.000000e+00 : f32
      %29 = vector.broadcast %cst_21 : f32 to vector<2x1xf32>
      %30 = arith.addf %29, %28 : vector<2x1xf32>
      %cst_22 = arith.constant 1.000000e+00 : f32
      %31 = vector.broadcast %cst_22 : f32 to vector<2x1xf32>
      %32 = arith.divf %31, %30 : vector<2x1xf32>
      %c0_23 = arith.constant 0 : index
      %c0_24 = arith.constant 0 : index
      %33 = vector.load %arg7[%c0_23, %c0_24] : memref<2x1xf32, #tpu.memory_space<vmem>>, vector<2x1xf32>
      tpu.vector_store %arg7[%c0_23, %c0_24], %32 {strides = array<i32>} : memref<2x1xf32, #tpu.memory_space<vmem>>, vector<2x1xf32>,
    } else {
    }
    return
  }
  func.func @transform_0(%arg0: i32, %arg1: i32) -> (i32, i32) {
    %c0_i32 = arith.constant 0 : i32
    return %arg0, %arg1 : i32, i32
  }
  func.func @transform_1(%arg0: i32, %arg1: i32) -> (i32, i32) {
    %c0_i32 = arith.constant 0 : i32
    %c0_i32_0 = arith.constant 0 : i32
    return %arg1, %c0_i32 : i32, i32
  }
  func.func @transform_2(%arg0: i32, %arg1: i32) -> (i32, i32) {
    %c0_i32 = arith.constant 0 : i32
    %c0_i32_0 = arith.constant 0 : i32
    %c0_i32_1 = arith.constant 0 : i32
    return %c0_i32, %c0_i32_0 : i32, i32
  }
  func.func @transform_3(%arg0: i32, %arg1: i32) -> (i32, i32) {
    %c0_i32 = arith.constant 0 : i32
    %c0_i32_0 = arith.constant 0 : i32
    %c0_i32_1 = arith.constant 0 : i32
    return %c0_i32, %c0_i32_0 : i32, i32
  }
  func.func @transform_4(%arg0: i32, %arg1: i32) -> (i32, i32) {
    %c0_i32 = arith.constant 0 : i32
    %c0_i32_0 = arith.constant 0 : i32
    %c0_i32_1 = arith.constant 0 : i32
    return %c0_i32, %c0_i32_0 : i32, i32
  }
  func.func @transform_5(%arg0: i32, %arg1: i32) -> (i32, i32) {
    %c0_i32 = arith.constant 0 : i32
    %c0_i32_0 = arith.constant 0 : i32
    return %arg0, %c0_i32 : i32, i32
  }
}

</mosaic_0001>

<bundles_post_ra>
// kernel: simple_cnn_forward.3
= control target key start
LH: loop header
LB: loop body
LE: loop exit
PB: predicated region body
PF: predicated region fallthrough
CT: control target
= control target key end

     0   :  { %s1342_s24 = smov 0   ;;  %s1439_s0 = inlined_call_operand.vmem [shape: bf16[128,27], index: 0, kind: input, shape index: {}]   ;;  %s1440_s1 = inlined_call_operand.vmem [shape: bf16[128,27], index: 1, kind: input, shape index: {}]   ;;  %s1441_s2 = inlined_call_operand.vmem [shape: bf16[128,27], index: 2, kind: input, shape index: {}]   ;;  %s1442_s3 = inlined_call_operand.vmem [shape: bf16[128,27], index: 3, kind: input, shape index: {}]   ;;  %s1443_s4 = inlined_call_operand.vmem [shape: bf16[27,32], index: 4, kind: input, shape index: {}]   ;;  %s1444_s5 = inlined_call_operand.vmem [shape: f32[1,32], index: 5, kind: input, shape index: {}]   ;;  %s1445_s6 = inlined_call_operand.vmem [shape: bf16[64,32], index: 6, kind: output, shape index: {0}]   ;;  %s1446_s7 = inlined_call_operand.vmem [shape: bf16[64,32], index: 7, kind: output, shape index: {1}]  }
   0x1 LB: > { %s1124_s25 = sadd.s32 4294967295, %s1299_s24   ;;  %p1128_p0 = scmp.ge.s32.totalorder %s1299_s24, 1  ;;  %s1299_s24 = sphi %s1342_s24, %s18_s24  }
   0x2   : > { %p274_p1 = scmp.lt.s32.totalorder %s1299_s24, 3 }
   0x4   : > { %p275_p2 = pnand %p1128_p0, %p274_p1 }
   0x5   : > { %v1275_v0 = vld [vmem:[%s1443_s4] sm:$0xff] (!%p275_p2)   ;;  %vm420_vm0 = vcmask (!%p275_p2), 1044480   ;;  %v1276_v1 = vld [vmem:[%s1443_s4 + $0x8] sm:$0x3f] (!%p275_p2)   ;;  %vm421_vm1 = vcmask (!%p275_p2), 1045504   ;;  %s1129_s30 = sshll.u32 (!%p275_p2), %s1124_s25, 3 }
   0x6   : > { %278 = sbr.rel (%p275_p2) target bundleno = 273 (0x111), region = 44  ;;  %1218 = vmatprep.subr.bf16.mxu0 (!%p275_p2), %v1275_v0  ;;  %1230 = vmatprep.subr.bf16.mxu1 (!%p275_p2), %v1275_v0  ;;  %v1301_v2 = vmov (!%p275_p2), 65535   ;;  %p327_p3 = scmp.lt.s32.totalorder (!%p275_p2), %s1129_s30, 15  ;;  %vm407_vm2 = vcmask (!%p275_p2), 220160   ;;  %v1389_v23 = vld [vmem:[%s1444_s5] ss:$0 sm:$0xff] (!%p275_p2) }
   0x7   : > { %1219 = vmatpush3.bf16.msra.mxu0 (!%p275_p2), %v1275_v0  ;;  %1231 = vmatpush3.bf16.msra.mxu1 (!%p275_p2), %v1275_v0  ;;  %v422_v3 = vsel (!%p275_p2), %vm420_vm0, 4294967295, %v1301_v2  ;;  %s1137_s23 = sshll.u32 (!%p275_p2), %s1124_s25, 2  ;;  %vm691_vm3 = vcmask (!%p275_p2), 257024  }
   0x8   : > { %v423_v4 = vsel (!%p275_p2), %vm421_vm1, %v422_v3, 0  ;;  %p351_p4 = scmp.lt.s32.totalorder (!%p275_p2), %s1137_s23, 7 }
   0x9   : > { %v425_v5 = vand.u32 (!%p275_p2), %v1276_v1, %v423_v4 }
   0xb   : > { %1220 = vmatprep.subr.bf16.mxu0 (!%p275_p2), %v425_v5  ;;  %1232 = vmatprep.subr.bf16.mxu1 (!%p275_p2), %v425_v5 }
   0xc   : > { %1221 = vmatpush3.bf16.msra.mxu0 (!%p275_p2), %v425_v5  ;;  %1233 = vmatpush3.bf16.msra.mxu1 (!%p275_p2), %v425_v5 }
   0xd   : > { %s1448_s30 = smov (!%p327_p3, %s1129_s30), 15  ;;  %1242 = vmatprep.subr.bf16.mxu0 %v1275_v0  ;;  %1254 = vmatprep.subr.bf16.mxu1 %v1275_v0  ;;  %s1450_s23 = smov (!%p351_p4, %s1137_s23), 7 }
   0xe   : > { %s1130_s8 = sshll.u32 %s1448_s30, 2  ;;  %s1138_s25 = sshll.u32 %s1450_s23, 2 }
   0xf   : > { %s330_s11 = scalar_lea.vmem %s1439_s0, %s1130_s8  ;;  %s336_s14 = scalar_lea.vmem %s1440_s1, %s1130_s8 }
  0x10   : > { %v1277_v6 = vld [vmem:[%s330_s11] sm:$0xff]   ;;  %v1279_v8 = vld [vmem:[%s330_s11 + $0x8] sm:$0xff]   ;;  %v1281_v10 = vld [vmem:[%s330_s11 + $0x10] sm:$0xff]   ;;  %s342_s17 = scalar_lea.vmem %s1441_s2, %s1130_s8  ;;  %s348_s20 = scalar_lea.vmem %s1442_s3, %s1130_s8 }
  0x11   : > { %v1278_v7 = vld [vmem:[%s336_s14] sm:$0xff]   ;;  %1222 = vmatprep.mubr.msk.bf16.mxu0 %vm407_vm2, %v1277_v6  ;;  %v1280_v9 = vld [vmem:[%s336_s14 + $0x8] sm:$0xff]   ;;  %v1282_v11 = vld [vmem:[%s336_s14 + $0x10] sm:$0xff]   ;;  %s1409_s28 = scalar_lea.vmem %s1445_s6, %s1138_s25  ;;  %s360_s8 = scalar_lea.vmem %s1446_s7, %s1138_s25 }
  0x12   : > { %1234 = vmatprep.mubr.msk.bf16.mxu1 %vm407_vm2, %v1278_v7  ;;  %1223 = vmatmul.mubr.msk.bf16.vlgmr.msra.gmra.mrb[0].mxu0 %vm407_vm2, %v1279_v8  ;;  %v1283_v12 = vld [vmem:[%s330_s11 + $0x18] sm:$0xff]   ;;  %v1285_v14 = vld [vmem:[%s342_s17] sm:$0xff]   ;;  %v1287_v16 = vld [vmem:[%s342_s17 + $0x8] sm:$0xff]  }
  0x13   : > { %1235 = vmatmul.mubr.msk.bf16.vlgmr.msra.gmra.mrb[0].mxu1 %vm407_vm2, %v1280_v9  ;;  %1243 = vmatpush3.bf16.msra.mxu0 %v1275_v0  ;;  %v1284_v13 = vld [vmem:[%s336_s14 + $0x18] sm:$0xff]   ;;  %v1286_v15 = vld [vmem:[%s348_s20] sm:$0xff]   ;;  %v1288_v17 = vld [vmem:[%s348_s20 + $0x8] sm:$0xff]  }
  0x14   : > { %1255 = vmatpush3.bf16.msra.mxu1 %v1275_v0  ;;  %1226 = vmatprep.mubr.msk.bf16.mxu0 %vm407_vm2, %v1281_v10  ;;  %v1289_v18 = vld [vmem:[%s342_s17 + $0x10] sm:$0xff]   ;;  %v1291_v20 = vld [vmem:[%s342_s17 + $0x18] sm:$0xff]  }
  0x15   : > { %1238 = vmatprep.mubr.msk.bf16.mxu1 %vm407_vm2, %v1282_v11  ;;  %1244 = vmatprep.subr.bf16.mxu0 %v425_v5  ;;  %v1290_v19 = vld [vmem:[%s348_s20 + $0x10] sm:$0xff]   ;;  %v1292_v21 = vld [vmem:[%s348_s20 + $0x18] sm:$0xff]  }
  0x16   : > { %1256 = vmatprep.subr.bf16.mxu1 %v425_v5 }
  0x17   : > { %1245 = vmatpush3.bf16.msra.mxu0 %v425_v5 }
  0x18   : > { %1257 = vmatpush3.bf16.msra.mxu1 %v425_v5 }
  0x1a   : > { %1227 = vmatmul.mubr.msk.bf16.gmra.mrb[4].mxu0 %vm407_vm2, %v1283_v12 }
  0x1b   : > { %1239 = vmatmul.mubr.msk.bf16.gmra.mrb[4].mxu1 %vm407_vm2, %v1284_v13  ;;  %1246 = vmatprep.mubr.msk.bf16.mxu0 %vm407_vm2, %v1285_v14 }
  0x1c   : > { %1258 = vmatprep.mubr.msk.bf16.mxu1 %vm407_vm2, %v1286_v15 }
  0x22   : > { %1247 = vmatmul.mubr.msk.bf16.vlgmr.msra.gmra.mrb[8].mxu0 %vm407_vm2, %v1287_v16 }
  0x23   : > { %1259 = vmatmul.mubr.msk.bf16.vlgmr.msra.gmra.mrb[8].mxu1 %vm407_vm2, %v1288_v17  ;;  %1250 = vmatprep.mubr.msk.bf16.mxu0 %vm407_vm2, %v1289_v18 }
  0x24   : > { %1262 = vmatprep.mubr.msk.bf16.mxu1 %vm407_vm2, %v1290_v19 }
  0x2a   : > { %1251 = vmatmul.mubr.msk.bf16.gmra.mrb[12].mxu0 %vm407_vm2, %v1291_v20 }
  0x2b   : > { %1263 = vmatmul.mubr.msk.bf16.gmra.mrb[12].mxu1 %vm407_vm2, %v1292_v21 }
  0xe5   : > { %v1224_v22 = vpop.f32.mrb[0].mxu0 }
  0xe6   : > { %v1236_v24 = vpop.f32.mrb[0].mxu1  ;;  %v461_v25 = vpop.f32.mrb[1].mxu0 }
  0xe7   : > { %v599_v26 = vmax.f32 %v1224_v22, %v1236_v24  ;;  %v566_v27 = vpop.f32.mrb[1].mxu1  ;;  %v1225_v28 = vpop.f32.mrb[2].mxu0 }
  0xe8   : > { %v597_v29 = vmax.f32 %v461_v25, %v566_v27  ;;  %v1237_v30 = vpop.f32.mrb[2].mxu1  ;;  %v464_v31 = vpop.f32.mrb[3].mxu0 }
  0xe9   : > { %v613_v32 = vadd.f32 %v1389_v23, %v599_v26  ;;  %v600_v33 = vmax.f32 %v1225_v28, %v1237_v30  ;;  %v569_v34 = vpop.f32.mrb[3].mxu1 }
  0xea   : > { %v611_v35 = vadd.f32 %v1389_v23, %v597_v29  ;;  %v598_v36 = vmax.f32 %v464_v31, %v569_v34 }
  0xeb   : > { %v621_v37 = vmax.f32 %v613_v32, 0.0  ;;  %v614_v38 = vadd.f32 %v1389_v23, %v600_v33 }
  0xec   : > { %v619_v39 = vmax.f32 %v611_v35, 0.0  ;;  %v612_v40 = vadd.f32 %v1389_v23, %v598_v36 }
  0xed   : > { %v637_v41 = vcombine.high %v621_v37, %v621_v37  ;;  %v622_v42 = vmax.f32 %v614_v38, 0.0  ;;  %v1228_v43 = vpop.f32.mrb[4].mxu0 }
  0xee   : > { %v635_v44 = vcombine.high %v619_v39, %v619_v39  ;;  %v620_v45 = vmax.f32 %v612_v40, 0.0  ;;  %v1240_v46 = vpop.f32.mrb[4].mxu1  ;;  %v477_v47 = vpop.f32.mrb[5].mxu0 }
  0xef   : > { %v638_v48 = vcombine.high %v622_v42, %v622_v42  ;;  %v603_v49 = vmax.f32 %v1228_v43, %v1240_v46  ;;  %v582_v50 = vpop.f32.mrb[5].mxu1  ;;  %v1229_v51 = vpop.f32.mrb[6].mxu0  ;;  %v653_v56 = vmax.f32 %v621_v37, %v637_v41 }
  0xf0   : > { %v636_v52 = vcombine.high %v620_v45, %v620_v45  ;;  %v601_v53 = vmax.f32 %v477_v47, %v582_v50  ;;  %v1241_v54 = vpop.f32.mrb[6].mxu1  ;;  %v480_v55 = vpop.f32.mrb[7].mxu0  ;;  %v651_v61 = vmax.f32 %v619_v39, %v635_v44 }
  0xf1   : > { %v654_v57 = vmax.f32 %v622_v42, %v638_v48  ;;  %v617_v58 = vadd.f32 %v1389_v23, %v603_v49  ;;  %v604_v59 = vmax.f32 %v1229_v51, %v1241_v54  ;;  %v585_v60 = vpop.f32.mrb[7].mxu1 }
  0xf2   : > { %v652_v62 = vmax.f32 %v620_v45, %v636_v52  ;;  %v615_v63 = vadd.f32 %v1389_v23, %v601_v53  ;;  %v602_v0 = vmax.f32 %v480_v55, %v585_v60 }
  0xf3   : > { %v668_v1 = vcombine.low %v653_v56, %v654_v57  ;;  %v625_v2 = vmax.f32 %v617_v58, 0.0  ;;  %v618_v3 = vadd.f32 %v1389_v23, %v604_v59 }
  0xf4   : > { %v667_v4 = vcombine.low %v651_v61, %v652_v62  ;;  %v623_v5 = vmax.f32 %v615_v63, 0.0  ;;  %v616_v6 = vadd.f32 %v1389_v23, %v602_v0 }
  0xf5   : > { %v641_v7 = vcombine.high %v625_v2, %v625_v2  ;;  %v626_v8 = vmax.f32 %v618_v3, 0.0  ;;  %v1248_v9 = vpop.f32.mrb[8].mxu0  ;;  %v1187_v15 = vpack.c.bf16 %v668_v1, %v668_v1 }
  0xf6   : > { %v1186_v10 = vpack.c.bf16 %v667_v4, %v667_v4  ;;  %v639_v11 = vcombine.high %v623_v5, %v623_v5  ;;  %v624_v12 = vmax.f32 %v616_v6, 0.0  ;;  %v1260_v13 = vpop.f32.mrb[8].mxu1  ;;  %v770_v14 = vpop.f32.mrb[9].mxu0 }
  0xf7   : > { %v642_v16 = vcombine.high %v626_v8, %v626_v8  ;;  %v908_v17 = vmax.f32 %v1248_v9, %v1260_v13  ;;  %v875_v18 = vpop.f32.mrb[9].mxu1  ;;  %v1249_v19 = vpop.f32.mrb[10].mxu0  ;;  %693 = vst.msk [vmem:[%s1409_s28 + $0x4] sm:$0xf] %vm691_vm3, %v1187_v15  ;;  %v657_v25 = vmax.f32 %v625_v2, %v641_v7 }
  0xf8   : > { %692 = vst.msk [vmem:[%s1409_s28] sm:$0xf] %vm691_vm3, %v1186_v10  ;;  %v640_v20 = vcombine.high %v624_v12, %v624_v12  ;;  %v906_v21 = vmax.f32 %v770_v14, %v875_v18  ;;  %v1261_v22 = vpop.f32.mrb[10].mxu1  ;;  %v773_v24 = vpop.f32.mrb[11].mxu0  ;;  %v655_v30 = vmax.f32 %v623_v5, %v639_v11 }
  0xf9   : > { %v658_v26 = vmax.f32 %v626_v8, %v642_v16  ;;  %v916_v27 = vadd.f32 %v1389_v23, %v908_v17  ;;  %v909_v28 = vmax.f32 %v1249_v19, %v1261_v22  ;;  %v878_v29 = vpop.f32.mrb[11].mxu1 }
  0xfa   : > { %v656_v31 = vmax.f32 %v624_v12, %v640_v20  ;;  %v914_v32 = vadd.f32 %v1389_v23, %v906_v21  ;;  %v907_v33 = vmax.f32 %v773_v24, %v878_v29 }
  0xfb   : > { %v670_v34 = vcombine.low %v657_v25, %v658_v26  ;;  %v924_v35 = vmax.f32 %v916_v27, 0.0  ;;  %v917_v36 = vadd.f32 %v1389_v23, %v909_v28 }
  0xfc   : > { %v669_v37 = vcombine.low %v655_v30, %v656_v31  ;;  %v922_v38 = vmax.f32 %v914_v32, 0.0  ;;  %v915_v39 = vadd.f32 %v1389_v23, %v907_v33 }
  0xfd   : > { %v940_v40 = vcombine.high %v924_v35, %v924_v35  ;;  %v925_v41 = vmax.f32 %v917_v36, 0.0  ;;  %v1252_v42 = vpop.f32.mrb[12].mxu0  ;;  %v1189_v48 = vpack.c.bf16 %v670_v34, %v670_v34 }
  0xfe   : > { %v1188_v43 = vpack.c.bf16 %v669_v37, %v669_v37  ;;  %v938_v44 = vcombine.high %v922_v38, %v922_v38  ;;  %v923_v45 = vmax.f32 %v915_v39, 0.0  ;;  %v1264_v46 = vpop.f32.mrb[12].mxu1  ;;  %v786_v47 = vpop.f32.mrb[13].mxu0 }
  0xff   : > { %v941_v49 = vcombine.high %v925_v41, %v925_v41  ;;  %v912_v50 = vmax.f32 %v1252_v42, %v1264_v46  ;;  %v891_v51 = vpop.f32.mrb[13].mxu1  ;;  %v1253_v52 = vpop.f32.mrb[14].mxu0  ;;  %695 = vst.msk [vmem:[%s1409_s28 + $0xc] sm:$0xf] %vm691_vm3, %v1189_v48  ;;  %v956_v57 = vmax.f32 %v924_v35, %v940_v40 }
 0x100   : > { %694 = vst.msk [vmem:[%s1409_s28 + $0x8] sm:$0xf] %vm691_vm3, %v1188_v43  ;;  %v939_v53 = vcombine.high %v923_v45, %v923_v45  ;;  %v910_v54 = vmax.f32 %v786_v47, %v891_v51  ;;  %v1265_v55 = vpop.f32.mrb[14].mxu1  ;;  %v789_v56 = vpop.f32.mrb[15].mxu0  ;;  %v954_v62 = vmax.f32 %v922_v38, %v938_v44 }
 0x101   : > { %v957_v58 = vmax.f32 %v925_v41, %v941_v49  ;;  %v920_v59 = vadd.f32 %v1389_v23, %v912_v50  ;;  %v913_v60 = vmax.f32 %v1253_v52, %v1265_v55  ;;  %v894_v61 = vpop.f32.mrb[15].mxu1 }
 0x102   : > { %v955_v63 = vmax.f32 %v923_v45, %v939_v53  ;;  %v918_v0 = vadd.f32 %v1389_v23, %v910_v54  ;;  %v911_v1 = vmax.f32 %v789_v56, %v894_v61 }
 0x103   : > { %v971_v2 = vcombine.low %v956_v57, %v957_v58  ;;  %v928_v3 = vmax.f32 %v920_v59, 0.0  ;;  %v921_v4 = vadd.f32 %v1389_v23, %v913_v60 }
 0x104   : > { %v970_v5 = vcombine.low %v954_v62, %v955_v63  ;;  %v926_v6 = vmax.f32 %v918_v0, 0.0  ;;  %v919_v7 = vadd.f32 %v1389_v23, %v911_v1 }
 0x105   : > { %v944_v8 = vcombine.high %v928_v3, %v928_v3  ;;  %v929_v9 = vmax.f32 %v921_v4, 0.0  ;;  %v1191_v13 = vpack.c.bf16 %v971_v2, %v971_v2 }
 0x106   : > { %v1190_v10 = vpack.c.bf16 %v970_v5, %v970_v5  ;;  %v942_v11 = vcombine.high %v926_v6, %v926_v6  ;;  %v927_v12 = vmax.f32 %v919_v7, 0.0 }
 0x107   : > { %v945_v14 = vcombine.high %v929_v9, %v929_v9  ;;  %995 = vst.msk [vmem:[%s360_s8 + $0x4] sm:$0xf] %vm691_vm3, %v1191_v13  ;;  %v960_v16 = vmax.f32 %v928_v3, %v944_v8 }
 0x108   : > { %994 = vst.msk [vmem:[%s360_s8] sm:$0xf] %vm691_vm3, %v1190_v10  ;;  %v943_v15 = vcombine.high %v927_v12, %v927_v12  ;;  %v958_v23 = vmax.f32 %v926_v6, %v942_v11 }
 0x109   : > { %v961_v17 = vmax.f32 %v929_v9, %v945_v14 }
 0x10a   : > { %v959_v18 = vmax.f32 %v927_v12, %v943_v15 }
 0x10b   : > { %v973_v19 = vcombine.low %v960_v16, %v961_v17 }
 0x10c   : > { %v972_v20 = vcombine.low %v958_v23, %v959_v18 }
 0x10d   : > { %v1193_v22 = vpack.c.bf16 %v973_v19, %v973_v19 }
 0x10e   : > { %v1192_v21 = vpack.c.bf16 %v972_v20, %v972_v20 }
 0x10f   : > { %997 = vst.msk [vmem:[%s360_s8 + $0xc] sm:$0xf] %vm691_vm3, %v1193_v22 }
 0x110   : > { %996 = vst.msk [vmem:[%s360_s8 + $0x8] sm:$0xf] %vm691_vm3, %v1192_v21 }
 0x111 PF: > { %s18_s24 = sadd.s32 1, %s1299_s24  }
 0x112   : > { %p15_p5 = scmp.ge.s32.totalorder %s18_s24, 4  }
 0x114   :  { %17 = sbr.rel (!%p15_p5) target bundleno = 1 (0x1), region = 95 }

// kernel: simple_cnn_forward.4
= control target key start
LH: loop header
LB: loop body
LE: loop exit
PB: predicated region body
PF: predicated region fallthrough
CT: control target
= control target key end

     0   :  { %s1954_s15 = smov 0   ;;  %s2738_s0 = inlined_call_operand.vmem [shape: bf16[2,10,5,32], index: 0, kind: input, shape index: {}]   ;;  %s2739_s1 = inlined_call_operand.vmem [shape: bf16[2,10,5,32], index: 1, kind: input, shape index: {}]   ;;  %s2740_s2 = inlined_call_operand.vmem [shape: bf16[288,64], index: 2, kind: input, shape index: {}]   ;;  %s2741_s3 = inlined_call_operand.vmem [shape: f32[1,64], index: 3, kind: input, shape index: {}]   ;;  %s2742_s4 = inlined_call_operand.vmem [shape: bf16[2,16,64], index: 4, kind: output, shape index: {}]  }
   0x1 LB: > { %s1711_s16 = sadd.s32 4294967295, %s1923_s15   ;;  %p1715_p0 = scmp.ge.s32.totalorder %s1923_s15, 1  ;;  %s1923_s15 = sphi %s1954_s15, %s14_s15  }
   0x2   : > { %p172_p1 = scmp.lt.s32.totalorder %s1923_s15, 3 }
   0x4   : > { %p173_p2 = pnand %p1715_p0, %p172_p1 }
   0x6   : > { %176 = sbr.rel (%p173_p2) target bundleno = 543 (0x21f), region = 36 }
   0xd   : > { %p203_p3 = scmp.lt.s32.totalorder %s1711_s16, 1  ;;  %s1925_s24 = smov 32   ;;  %v1926_v24 = vmov 1983009808   ;;  %v637_v26 = vlaneseq  ;;  %v2071_v48 = vld [vmem:[%s2740_s2 + $0x40] sm:$0xff]   ;;  %v2098_v56 = vld [vmem:[%s2740_s2 + $0x48] sm:$0xff]  }
   0xe   : > { %v635_v25 = vunpack.c.l.s4 %v1926_v24  ;;  %v2076_v49 = vld [vmem:[%s2740_s2] sm:$0xff]   ;;  %1786 = vmatprep.subr.bf16.mxu0 %v2071_v48  ;;  %v2104_v57 = vld [vmem:[%s2740_s2 + $0x8] sm:$0xff]   ;;  %s1927_s7 = smov 64   ;;  %v2116_v59 = vld [vmem:[%s2740_s2 + $0x50] sm:$0xff]   ;;  %s1928_s28 = smov 96   ;;  %vm502_vm0 = vcmask 261120  }
   0xf   : > { %s2761_s16 = smov (!%p203_p3, %s1711_s16), 1  ;;  %v638_v37 = vshrl.u32 %v637_v26, 7  ;;  %1787 = vmatpush3.bf16.msra.mxu0 %v2076_v49  ;;  %v2125_v61 = vld [vmem:[%s2740_s2 + $0x10] sm:$0xff]   ;;  %vm527_vm1 = vcmask 523264   ;;  %vm544_vm2 = vcmask 785408   ;;  %vm1641_vm3 = vcmask 519168  }
  0x10   : > { %s1866_s17 = smul.u32 40, %s2761_s16  ;;  %v636_v36 = vunpack.c.0.s8 %v635_v25  ;;  %1788 = vmatprep.subr.bf16.mxu0 %v2098_v56  ;;  %v2176_v25 = vld [vmem:[%s2740_s2 + $0x60] sm:$0xff]  }
  0x12   : > { %s1968_s20 = scalar_lea.vmem %s2739_s1, %s1866_s17  ;;  %s1973_s23 = scalar_lea.vmem %s2738_s0, %s1866_s17  ;;  %v2078_v50 = vsub.s32 %v636_v36, %v638_v37  ;;  %v2198_v37 = vld [vmem:[%s2740_s2 + $0x68] sm:$0xff]  }
  0x13   : > { %v1976_v0 = vld [vmem:[%s1968_s20 + $0x8] sm:$0x7]  ;;  %v1979_v1 = vld [vmem:[%s1968_s20] sm:$0x7]  ;;  %v1982_v2 = vld [vmem:[%s1968_s20 + $0xc] sm:$0x7]  ;;  %1789 = vmatpush3.bf16.msra.mxu0 %v2104_v57 }
  0x14   : > { %v1986_v3 = vcombine.low %v1976_v0, %v1976_v0  ;;  %v1990_v4 = vcombine.low %v1979_v1, %v1979_v1  ;;  %v1993_v5 = vld [vmem:[%s1968_s20 + $0x4] sm:$0x7]  ;;  %v1996_v6 = vld [vmem:[%s1973_s23 + $0x8] sm:$0x7]  ;;  %v2003_v8 = vcombine.low %v1982_v2, %v1982_v2  ;;  %v2018_v12 = vld [vmem:[%s1973_s23 + $0x10] sm:$0x7]  ;;  %1790 = vmatprep.subr.bf16.mxu0 %v2116_v59 }
  0x15   : > { %v1999_v7 = vld [vmem:[%s1973_s23 + $0x4] sm:$0x7]  ;;  %v2007_v9 = vcombine.low %v1993_v5, %v1993_v5  ;;  %v2011_v10 = vcombine.low %v1996_v6, %v1996_v6  ;;  %2748 = vst [vmem:[#allocation2_spill] sm:$0xff] %v2018_v12  ;;  %v2021_v13 = vld [vmem:[%s1973_s23 + $0xc] sm:$0x7]  ;;  %v2032_v15 = vcombine.low %v2018_v12, %v2018_v12 }
  0x16   : > { %v2015_v11 = vcombine.low %v1999_v7, %v1999_v7  ;;  %v2024_v14 = vld [vmem:[%s1973_s23] sm:$0x7]  ;;  %304 = vrot.lane.b32.xlu1 %v1986_v3, %s1925_s24  ;;  %300 = vrot.lane.b32.xlu0 %v1990_v4, %s1925_s24  ;;  %v2036_v16 = vcombine.low %v2021_v13, %v2021_v13  ;;  %v1071_v38 = vshrl.u32 %v2003_v8, 16  ;;  %v1073_v39 = vshll.u32 %v2003_v8, 16  ;;  %v2119_v60 = vld [vmem:[%s1973_s23 + $0x1c] sm:$0x7] }
  0x17   : > { %v1728_v17 = vcombine.low %v2024_v14, %v2024_v14  ;;  %v355_v18 = vshrl.u32 %v2011_v10, 16  ;;  %v357_v19 = vshll.u32 %v2011_v10, 16  ;;  %v371_v22 = vshll.u32 %v2032_v15, 16  ;;  %2750 = vst [vmem:[#allocation4_spill] sm:$0xff] %v2119_v60  ;;  %v2128_v62 = vld [vmem:[%s1973_s23 + $0x18] sm:$0x7]  ;;  %1791 = vmatpush3.bf16.msra.mxu0 %v2125_v61 }
  0x18   : > { %v348_v20 = vshrl.u32 %v2015_v11, 16  ;;  %v350_v21 = vshll.u32 %v2015_v11, 16  ;;  %v364_v23 = vshll.u32 %v2036_v16, 16  ;;  %v369_v29 = vshrl.u32 %v2032_v15, 16  ;;  %2751 = vst [vmem:[#allocation5_spill] sm:$0xff] %v2128_v62 }
  0x19   : > { %v359_v27 = vrot.slane %v357_v19, 1  ;;  %v373_v30 = vrot.slane %v371_v22, 1  ;;  %v362_v31 = vshrl.u32 %v2036_v16, 16  ;;  %v343_v33 = vshll.u32 %v1728_v17, 16 }
  0x1a   : > { %v352_v28 = vrot.slane %v350_v21, 1  ;;  %306 = vrot.lane.b32.xlu1 %v2003_v8, %s1925_s24  ;;  %302 = vrot.lane.b32.xlu0 %v2007_v9, %s1925_s24  ;;  %v366_v32 = vrot.slane %v364_v23, 1  ;;  %v1064_v40 = vshrl.u32 %v1986_v3, 16  ;;  %v1066_v41 = vshll.u32 %v1986_v3, 16 }
  0x1b   : > { %v2052_v34 = vor.u32 %v359_v27, %v355_v18  ;;  %v2064_v42 = vor.u32 %v373_v30, %v369_v29  ;;  %v341_v44 = vshrl.u32 %v1728_v17, 16  ;;  %v345_v45 = vrot.slane %v343_v33, 1  ;;  %v2136_v63 = vld [vmem:[%s1973_s23 + $0x20] ss:$0 sps:$4 sm:$0x77]   ;;  %v2144_v18 = vld [vmem:[%s2740_s2 + $0x58] sm:$0xff]  }
  0x1c   : > { %v2054_v35 = vor.u32 %v352_v28, %v348_v20  ;;  %v2066_v43 = vor.u32 %v366_v32, %v362_v31  ;;  %v1075_v46 = vrot.slane %v1073_v39, 1  ;;  %v1068_v47 = vrot.slane %v1066_v41, 1  ;;  %v2139_v17 = vld [vmem:[%s1973_s23 + $0x14] sm:$0x7]  ;;  %v2153_v20 = vld [vmem:[%s2740_s2 + $0x18] sm:$0xff]   ;;  %1792 = vmatprep.subr.bf16.mxu0 %v2144_v18  ;;  %v2183_v27 = vld [vmem:[%s2740_s2 + $0x20] sm:$0xff]  }
  0x1d   : > { %v2088_v53 = vor.u32 %v345_v45, %v341_v44  ;;  %2752 = vst [vmem:[#allocation6_spill] sm:$0xff] %v2139_v17  ;;  %v2147_v19 = vld [vmem:[%s1973_s23 + $0x24] ss:$0 sps:$4 sm:$0x77]   ;;  %v2157_v21 = vcombine.low %v2119_v60, %v2119_v60  ;;  %v2161_v22 = vcombine.low %v2128_v62, %v2128_v62  ;;  %v2170_v23 = vcombine.low %v2139_v17, %v2139_v17 }
  0x1e   : > { %440 = vrot.lane.b32.xlu1 %v2052_v34, %s1925_s24  ;;  %438 = vrot.lane.b32.xlu0 %v2054_v35, %s1925_s24  ;;  %v2080_v51 = vor.u32 %v1075_v46, %v1071_v38  ;;  %v2082_v52 = vor.u32 %v1068_v47, %v1064_v40  ;;  %v434_v24 = vshll.u32 %v2136_v63, 16  ;;  %v498_v28 = vshll.u32 %v2147_v19, 16  ;;  %v2205_v40 = vld [vmem:[%s2740_s2 + $0x28] sm:$0xff]  }
  0x1f   : > { %v378_v26 = vshll.u32 %v2170_v23, 16  ;;  %1793 = vmatpush3.bf16.msra.mxu0 %v2153_v20  ;;  %v392_v29 = vshll.u32 %v2157_v21, 16  ;;  %v385_v30 = vshll.u32 %v2161_v22, 16  ;;  %v432_v31 = vshrl.u32 %v2136_v63, 16 }
  0x20   : > { %v1315_v54 = vrot.slane %v2080_v51, %v2078_v50  ;;  %v1299_v55 = vrot.slane %v2082_v52, %v2078_v50  ;;  %1794 = vmatprep.subr.bf16.mxu0 %v2176_v25  ;;  %v436_v32 = vrot.slane %v434_v24, 1  ;;  %v496_v33 = vshrl.u32 %v2147_v19, 16 }
  0x21   : > { %v500_v36 = vrot.slane %v498_v28, 1  ;;  %v376_v38 = vshrl.u32 %v2170_v23, 16  ;;  %v380_v39 = vrot.slane %v378_v26, 1  ;;  %v390_v41 = vshrl.u32 %v2157_v21, 16 }
  0x22   : > { %444 = vrot.lane.b32.xlu1 %v2064_v42, %s1925_s24  ;;  %442 = vrot.lane.b32.xlu0 %v2066_v43, %s1925_s24  ;;  %v2106_v58 = vcombine.low %v1299_v55, %v1315_v54  ;;  %v394_v44 = vrot.slane %v392_v29, 1  ;;  %v383_v45 = vshrl.u32 %v2161_v22, 16  ;;  %v387_v46 = vrot.slane %v385_v30, 1  ;;  %v2221_v55 = vld [vmem:[%s2740_s2 + $0x70] sm:$0xff]   ;;  %v2243_v30 = vld [vmem:[%s2740_s2 + $0x80] sm:$0xff]  }
  0x23   : > { %1795 = vmatpush3.bf16.msra.mxu0 %v2183_v27  ;;  %v2214_v47 = vor.u32 %v436_v32, %v432_v31  ;;  %v2216_v54 = vor.u32 %v500_v36, %v496_v33  ;;  %v2233_v26 = vor.u32 %v380_v39, %v376_v38  ;;  %v2250_v31 = vld [vmem:[%s1968_s20 + $0x14] sm:$0x7]  ;;  %v1059_v32 = vshll.u32 %v2007_v9, 16  ;;  %v2258_v39 = vld [vmem:[%s1968_s20 + $0x10] sm:$0x7]  ;;  %1850 = vmatprep.subr.bf16.mxu1 %v2243_v30 }
  0x24   : > { %2749 = vst [vmem:[#allocation3_spill] sm:$0xff] %v2106_v58  ;;  %1796 = vmatprep.subr.bf16.mxu0 %v2198_v37  ;;  %v2235_v28 = vor.u32 %v394_v44, %v390_v41  ;;  %v2237_v29 = vor.u32 %v387_v46, %v383_v45  ;;  %2753 = vst [vmem:[#allocation7_spill] sm:$0xff] %v2250_v31  ;;  %v647_v36 = vrot.slane %v2052_v34, %v2078_v50  ;;  %v2279_v46 = vld [vmem:[%s2740_s2 + $0x38] sm:$0xff]   ;;  %v2289_v58 = vld [vmem:[%s2740_s2 + $0x88] sm:$0xff]  }
  0x25   : > { %v743_v24 = vrot.slane %v2214_v47, %v2078_v50  ;;  %v663_v38 = vrot.slane %v2066_v43, %v2078_v50  ;;  %v695_v41 = vrot.slane %v2233_v26, %v2078_v50  ;;  %1851 = vmatpush3.bf16.msra.mxu1 %v2243_v30 }
  0x26   : > { %398 = vrot.lane.b32.xlu1 %v2054_v35, %s1927_s7  ;;  %396 = vrot.lane.b32.xlu0 %v2088_v53, %s1927_s7  ;;  %v711_v44 = vrot.slane %v2237_v29, %v2078_v50  ;;  %v727_v45 = vrot.slane %v2235_v28, %v2078_v50 }
  0x27   : > { %1797 = vmatpush3.bf16.msra.mxu0 %v2205_v40  ;;  %1852 = vmatprep.subr.bf16.mxu1 %v2289_v58 }
  0x28   : > { %1798 = vmatprep.subr.bf16.mxu0 %v2221_v55  ;;  %v1745_v62 = vcombine.low %v711_v44, %v727_v45 }
  0x29   : > { %1853 = vmatpush3.bf16.msra.mxu1 %v2289_v58 }
  0x2a   : > { %402 = vrot.lane.b32.xlu1 %v2066_v43, %s1927_s7  ;;  %400 = vrot.lane.b32.xlu0 %v2052_v34, %s1927_s7 }
  0x2b   : > { %1818 = vmatprep.subr.bf16.mxu1 %v2071_v48 }
  0x2e   : > { %459 = vrot.lane.b32.xlu1 %v2036_v16, %s1927_s7  ;;  %457 = vrot.lane.b32.xlu0 %v2011_v10, %s1927_s7 }
  0x32   : > { %463 = vrot.lane.b32.xlu1 %v2170_v23, %s1927_s7  ;;  %461 = vrot.lane.b32.xlu0 %v2032_v15, %s1927_s7 }
  0x36   : > { %417 = vrot.lane.b32.xlu1 %v2011_v10, %s1928_s28  ;;  %415 = vrot.lane.b32.xlu0 %v2015_v11, %s1928_s28  ;;  %v759_v10 = vrot.slane %v2216_v54, %v2078_v50  ;;  %v2231_v11 = vld [vmem:[%s2740_s2 + $0x30] sm:$0xff]  }
  0x37   : > { %1799 = vmatpush3.bf16.msra.mxu0 %v2231_v11 }
  0x38   : > { %v1747_v33 = vcombine.low %v743_v24, %v759_v10  ;;  %v1741_v24 = vcombine.low %v647_v36, %v663_v38  ;;  %v2283_v10 = vcombine.low %v2250_v31, %v2250_v31  ;;  %v1724_v36 = vcombine.low %v2258_v39, %v2258_v39 }
  0x39   : > { %v1057_v38 = vshrl.u32 %v2007_v9, 16  ;;  %v1061_v31 = vrot.slane %v1059_v32, 1 }
  0x3a   : > { %421 = vrot.lane.b32.xlu1 %v2032_v15, %s1928_s28  ;;  %419 = vrot.lane.b32.xlu0 %v2036_v16, %s1928_s28  ;;  %v2264_v15 = vld [vmem:[%s2740_s2 + $0x78] sm:$0xff]   ;;  %v679_v16 = vrot.slane %v2064_v42, %v2078_v50  ;;  %v778_v17 = vrot.slane %v1741_v24, %v2078_v50  ;;  %v1080_v32 = vshll.u32 %v1724_v36, 16 }
  0x3b   : > { %1800 = vmatprep.subr.bf16.mxu0 %v2264_v15 }
  0x3c   : > { %v1743_v60 = vcombine.low %v679_v16, %v695_v41  ;;  %v813_v16 = vrot.slane %v1745_v62, %v2078_v50  ;;  %v827_v41 = vrot.slane %v1747_v33, %v2078_v50  ;;  %1801 = vmatpush3.bf16.msra.mxu0 %v2279_v46  ;;  %v1052_v62 = vshll.u32 %v1990_v4, 16 }
  0x3d   : > { %1858 = vmatprep.subr.bf16.mxu0 %v2243_v30 }
  0x3e   : > { %481 = vrot.lane.b32.xlu1 %v2003_v8, %s1928_s28  ;;  %479 = vrot.lane.b32.xlu0 %v1986_v3, %s1928_s28  ;;  %v792_v12 = vrot.slane %v1743_v60, %v2078_v50  ;;  %v830_v45 = vcombine.low %v813_v16, %v827_v41  ;;  %v1062_v60 = vor.u32 %v1061_v31, %v1057_v38  ;;  %v1054_v48 = vrot.slane %v1052_v62, 1 }
  0x3f   : > { %v1082_v31 = vrot.slane %v1080_v32, 1 }
  0x40   : > { %v795_v44 = vcombine.low %v778_v17, %v792_v12  ;;  %v1050_v12 = vshrl.u32 %v1990_v4, 16  ;;  %v1078_v17 = vshrl.u32 %v1724_v36, 16  ;;  %v2348_v4 = vld [vmem:[%s1968_s20 + $0x18] sm:$0x7] }
  0x42   : > { %485 = vrot.lane.b32.xlu1 %v2283_v10, %s1928_s28  ;;  %483 = vrot.lane.b32.xlu0 %v1724_v36, %s1928_s28  ;;  %v2324_v33 = vor.u32 %v1082_v31, %v1078_v17 }
  0x43   : > { %1854 = vmatprep.mubr.msk.bf16.mxu1 %vm502_vm0, %v795_v44 }
  0x44   : > { %1855 = vmatmul.mubr.msk.bf16.vlgmr.msra.gmra.mrb[0].mxu1 %vm502_vm0, %v830_v45 }
  0x45   : > { %1819 = vmatpush3.bf16.msra.mxu1 %v2076_v49  ;;  %v1055_v49 = vor.u32 %v1054_v48, %v1050_v12 }
  0x46   : > { %1130 = vrot.lane.b32.xlu1 %v1062_v60, %s1925_s24  ;;  %1047 = vrot.lane.b32.xlu0 %v2088_v53, %s1925_s24 }
  0x47   : > { %1820 = vmatprep.subr.bf16.mxu1 %v2098_v56 }
  0x49   : > { %1821 = vmatpush3.bf16.msra.mxu1 %v2104_v57  ;;  %v2415_v57 = vld [vmem:[%s1968_s20 + $0x20] sm:$0x7] }
  0x4a   : > { %1134 = vrot.lane.b32.xlu1 %v2080_v51, %s1925_s24  ;;  %1132 = vrot.lane.b32.xlu0 %v2082_v52, %s1925_s24 }
  0x4b   : > { %1822 = vmatprep.subr.bf16.mxu1 %v2116_v59 }
  0x4d   : > { %1823 = vmatpush3.bf16.msra.mxu1 %v2125_v61  ;;  %v1087_v61 = vshll.u32 %v2283_v10, 16 }
  0x4e   : > { %1105 = vrot.lane.b32.xlu1 %v1055_v49, %s1927_s7  ;;  %1136 = vrot.lane.b32.xlu0 %v2324_v33, %s1925_s24 }
  0x4f   : > { %1824 = vmatprep.subr.bf16.mxu1 %v2144_v18  ;;  %v1738_v18 = vcombine.low %v2415_v57, %v2415_v57 }
  0x51   : > { %1825 = vmatpush3.bf16.msra.mxu1 %v2153_v20 }
  0x52   : > { %1109 = vrot.lane.b32.xlu1 %v2082_v52, %s1927_s7  ;;  %1107 = vrot.lane.b32.xlu0 %v1062_v60, %s1927_s7 }
  0x53   : > { %1826 = vmatprep.subr.bf16.mxu1 %v2176_v25  ;;  %v1126_v25 = vshll.u32 %v1738_v18, 16 }
  0x55   : > { %1827 = vmatpush3.bf16.msra.mxu1 %v2183_v27  ;;  %v1089_v27 = vrot.slane %v1087_v61, 1 }
  0x56   : > { %1146 = vrot.lane.b32.xlu1 %v1986_v3, %s1927_s7  ;;  %1111 = vrot.lane.b32.xlu0 %v2080_v51, %s1927_s7  ;;  %v2357_v3 = vcombine.low %v2348_v4, %v2348_v4  ;;  %v2360_v51 = vld [vmem:[%s1968_s20 + $0x1c] sm:$0x7] }
  0x57   : > { %1828 = vmatprep.subr.bf16.mxu1 %v2198_v37 }
  0x58   : > { %v1094_v59 = vshll.u32 %v2357_v3, 16 }
  0x59   : > { %1829 = vmatpush3.bf16.msra.mxu1 %v2205_v40 }
  0x5a   : > { %1150 = vrot.lane.b32.xlu1 %v1724_v36, %s1927_s7  ;;  %1148 = vrot.lane.b32.xlu0 %v2003_v8, %s1927_s7  ;;  %v2370_v8 = vcombine.low %v2360_v51, %v2360_v51 }
  0x5b   : > { %1830 = vmatprep.subr.bf16.mxu1 %v2221_v55 }
  0x5c   : > { %v1101_v37 = vshll.u32 %v2370_v8, 16 }
  0x5d   : > { %1831 = vmatpush3.bf16.msra.mxu1 %v2231_v11  ;;  %v1124_v11 = vshrl.u32 %v1738_v18, 16 }
  0x5e   : > { %308 = vrot.lane.b32.xlu1 %v1724_v36, %s1925_s24  ;;  %1152 = vrot.lane.b32.xlu0 %v2283_v10, %s1927_s7  ;;  %v1099_v36 = vshrl.u32 %v2370_v8, 16  ;;  %v1103_v38 = vrot.slane %v1101_v37, 1 }
  0x5f   : > { %1832 = vmatprep.subr.bf16.mxu1 %v2264_v15  ;;  %v1128_v15 = vrot.slane %v1126_v25, 1 }
  0x60   : > { %v2449_v44 = vor.u32 %v1103_v38, %v1099_v36 }
  0x61   : > { %1833 = vmatpush3.bf16.msra.mxu1 %v2279_v46  ;;  %v2447_v41 = vor.u32 %v1128_v15, %v1124_v11 }
  0x62   : > { %312 = vrot.lane.b32.xlu1 %v2357_v3, %s1925_s24  ;;  %310 = vrot.lane.b32.xlu0 %v2283_v10, %s1925_s24 }
  0x66   : > { %446 = vrot.lane.b32.xlu1 %v2233_v26, %s1925_s24  ;;  %314 = vrot.lane.b32.xlu0 %v2370_v8, %s1925_s24 }
  0x6a   : > { %450 = vrot.lane.b32.xlu1 %v2235_v28, %s1925_s24  ;;  %448 = vrot.lane.b32.xlu0 %v2237_v29, %s1925_s24 }
  0x6e   : > { %1121 = vrot.lane.b32.xlu1 %v2007_v9, %s1928_s28  ;;  %452 = vrot.lane.b32.xlu0 %v2214_v47, %s1925_s24 }
  0x72   : > { %1164 = vrot.lane.b32.xlu1 %v2066_v43, %s1928_s28  ;;  %1162 = vrot.lane.b32.xlu0 %v2052_v34, %s1928_s28 }
  0x76   : > { %1168 = vrot.lane.b32.xlu1 %v2233_v26, %s1928_s28  ;;  %1166 = vrot.lane.b32.xlu0 %v2064_v42, %s1928_s28 }
  0x7a   : > { %406 = vrot.lane.b32.xlu1 %v2233_v26, %s1927_s7  ;;  %404 = vrot.lane.b32.xlu0 %v2064_v42, %s1927_s7 }
  0x7e   : > { %410 = vrot.lane.b32.xlu1 %v2235_v28, %s1927_s7  ;;  %408 = vrot.lane.b32.xlu0 %v2237_v29, %s1927_s7 }
  0x82   : > { %467 = vrot.lane.b32.xlu1 %v2157_v21, %s1927_s7  ;;  %465 = vrot.lane.b32.xlu0 %v2161_v22, %s1927_s7 }
  0x86   : > { %471 = vrot.lane.b32.xlu1 %v2147_v19, %s1927_s7  ;;  %469 = vrot.lane.b32.xlu0 %v2136_v63, %s1927_s7 }
  0x88   : > { %v305_v9 = vpop.permute.xlu1 %304  ;;  %v301_v52 = vpop.permute.xlu0 %300 }
  0x89   : > { %v511_v61 = vsel %vm502_vm0, %v1996_v6, %v305_v9 }
  0x8a   : > { %425 = vrot.lane.b32.xlu1 %v2161_v22, %s1928_s28  ;;  %423 = vrot.lane.b32.xlu0 %v2170_v23, %s1928_s28  ;;  %v2426_v22 = vld [vmem:[%s1968_s20 + $0x24] ss:$0 sps:$4 sm:$0x77]   ;;  %v1092_v23 = vshrl.u32 %v2357_v3, 16 }
  0x8c   : > { %v2412_v53 = vpop.permute.xlu1 %306  ;;  %v303_v56 = vpop.permute.xlu0 %302 }
  0x8e   : > { %429 = vrot.lane.b32.xlu1 %v2136_v63, %s1928_s28  ;;  %427 = vrot.lane.b32.xlu0 %v2157_v21, %s1928_s28  ;;  %v1096_v63 = vrot.slane %v1094_v59, 1  ;;  %v1085_v21 = vshrl.u32 %v2283_v10, 16 }
  0x90   : > { %v441_v19 = vpop.permute.xlu1 %440  ;;  %v439_v20 = vpop.permute.xlu0 %438  ;;  %v2438_v46 = vor.u32 %v1096_v63, %v1092_v23  ;;  %v2440_v24 = vor.u32 %v1089_v27, %v1085_v21  ;;  %v505_v23 = vsel %vm502_vm0, %v2024_v14, %v301_v52 }
  0x91   : > { %v2482_v25 = vsel %vm502_vm0, %v1993_v5, %v439_v20  ;;  %v514_v20 = vsel %vm502_vm0, %v2021_v13, %v2412_v53 }
  0x92   : > { %489 = vrot.lane.b32.xlu1 %v2370_v8, %s1928_s28  ;;  %487 = vrot.lane.b32.xlu0 %v2357_v3, %s1928_s28 }
  0x94   : > { %v445_v40 = vpop.permute.xlu1 %444  ;;  %v443_v55 = vpop.permute.xlu0 %442 }
  0x95   : > { %v2509_v27 = vsel %vm502_vm0, %v2258_v39, %v445_v40  ;;  %v2513_v37 = vsel %vm502_vm0, %v1982_v2, %v443_v55 }
  0x96   : > { %493 = vrot.lane.b32.xlu1 %v2426_v22, %s1928_s28  ;;  %491 = vrot.lane.b32.xlu0 %v1738_v18, %s1928_s28 }
  0x98   : > { %v399_v10 = vpop.permute.xlu1 %398  ;;  %v397_v16 = vpop.permute.xlu0 %396 }
  0x99   : > { %v529_v9 = vsel %vm527_vm1, %v505_v23, %v397_v16 }
  0x9a   : > { %1140 = vrot.lane.b32.xlu1 %v2438_v46, %s1925_s24  ;;  %1138 = vrot.lane.b32.xlu0 %v2440_v24, %s1925_s24 }
  0x9c   : > { %v403_v45 = vpop.permute.xlu1 %402  ;;  %v401_v60 = vpop.permute.xlu0 %400 }
  0x9d   : > { %v535_v11 = vsel %vm527_vm1, %v514_v20, %v403_v45  ;;  %v533_v13 = vsel %vm527_vm1, %v511_v61, %v401_v60 }
  0x9e   : > { %1144 = vrot.lane.b32.xlu1 %v2447_v41, %s1925_s24  ;;  %1142 = vrot.lane.b32.xlu0 %v2449_v44, %s1925_s24 }
  0xa0   : > { %v460_v62 = vpop.permute.xlu1 %459  ;;  %v458_v32 = vpop.permute.xlu0 %457 }
  0xa1   : > { %v586_v14 = vsel %vm527_vm1, %v2482_v25, %v458_v32 }
  0xa2   : > { %1115 = vrot.lane.b32.xlu1 %v2440_v24, %s1927_s7  ;;  %1113 = vrot.lane.b32.xlu0 %v2324_v33, %s1927_s7 }
  0xa4   : > { %v464_v12 = vpop.permute.xlu1 %463  ;;  %v462_v48 = vpop.permute.xlu0 %461 }
  0xa5   : > { %v592_v53 = vsel %vm527_vm1, %v2509_v27, %v464_v12  ;;  %v590_v15 = vsel %vm527_vm1, %v2513_v37, %v462_v48 }
  0xa6   : > { %1119 = vrot.lane.b32.xlu1 %v2449_v44, %s1927_s7  ;;  %1117 = vrot.lane.b32.xlu0 %v2438_v46, %s1927_s7 }
  0xa8   : > { %v418_v17 = vpop.permute.xlu1 %417  ;;  %v416_v31 = vpop.permute.xlu0 %415 }
  0xaa   : > { %1156 = vrot.lane.b32.xlu1 %v2370_v8, %s1927_s7  ;;  %1154 = vrot.lane.b32.xlu0 %v2357_v3, %s1927_s7  ;;  %v508_v8 = vsel %vm502_vm0, %v1999_v7, %v303_v56  ;;  %v2478_v3 = vsel %vm502_vm0, %v1976_v0, %v441_v19  ;;  %v546_v56 = vsel %vm544_vm2, %v529_v9, %v416_v31 }
  0xab   : > { %v531_v6 = vsel %vm527_vm1, %v508_v8, %v399_v10 }
  0xac   : > { %v422_v49 = vpop.permute.xlu1 %421  ;;  %v420_v59 = vpop.permute.xlu0 %419  ;;  %v548_v0 = vsel %vm544_vm2, %v531_v6, %v418_v17 }
  0xad   : > { %v552_v2 = vsel %vm544_vm2, %v535_v11, %v422_v49  ;;  %v550_v55 = vsel %vm544_vm2, %v533_v13, %v420_v59 }
  0xae   : > { %1160 = vrot.lane.b32.xlu1 %v2426_v22, %s1927_s7  ;;  %1158 = vrot.lane.b32.xlu0 %v1738_v18, %s1927_s7  ;;  %v588_v18 = vsel %vm527_vm1, %v2478_v3, %v460_v62  ;;  %s1783_s7 = sshll.u32 %s2761_s16, 3 }
  0xaf   : > { %s217_s21 = scalar_lea.vmem %s2742_s4, %s1783_s7 }
  0xb0   : > { %v2490_v52 = vpop.permute.xlu1 %481  ;;  %v2492_v7 = vpop.permute.xlu0 %479 }
  0xb1   : > { %v604_v5 = vsel %vm544_vm2, %v588_v18, %v2490_v52  ;;  %v602_v19 = vsel %vm544_vm2, %v586_v14, %v2492_v7 }
  0xb2   : > { %v649_v63 = vcombine.low %v548_v0, %v604_v5  ;;  %v633_v21 = vcombine.low %v546_v56, %v602_v19  ;;  %1172 = vrot.lane.b32.xlu1 %v2235_v28, %s1928_s28  ;;  %1170 = vrot.lane.b32.xlu0 %v2237_v29, %s1928_s28 }
  0xb4   : > { %v656_v36 = vrot.slane %v649_v63, %v2078_v50  ;;  %v640_v38 = vrot.slane %v633_v21, %v2078_v50  ;;  %v2523_v39 = vpop.permute.xlu1 %485  ;;  %v2525_v40 = vpop.permute.xlu0 %483 }
  0xb5   : > { %v608_v10 = vsel %vm544_vm2, %v592_v53, %v2523_v39  ;;  %v606_v16 = vsel %vm544_vm2, %v590_v15, %v2525_v40 }
  0xb6   : > { %v681_v45 = vcombine.low %v552_v2, %v608_v10  ;;  %v665_v60 = vcombine.low %v550_v55, %v606_v16  ;;  %1176 = vrot.lane.b32.xlu1 %v2216_v54, %s1928_s28  ;;  %1174 = vrot.lane.b32.xlu0 %v2214_v47, %s1928_s28  ;;  %v1740_v17 = vcombine.low %v640_v38, %v656_v36 }
  0xb8   : > { %v688_v62 = vrot.slane %v681_v45, %v2078_v50  ;;  %v672_v32 = vrot.slane %v665_v60, %v2078_v50  ;;  %v1131_v12 = vpop.permute.xlu1 %1130  ;;  %v1048_v48 = vpop.permute.xlu0 %1047  ;;  %v771_v61 = vrot.slane %v1740_v17, %v2078_v50 }
  0xb9   : > { %v1215_v2 = vsel %vm502_vm0, %v2054_v35, %v1131_v12  ;;  %v1187_v55 = vsel %vm502_vm0, %v1979_v1, %v1048_v48 }
  0xba   : > { %v1742_v31 = vcombine.low %v672_v32, %v688_v62 }
  0xbc   : > { %v1135_v49 = vpop.permute.xlu1 %1134  ;;  %v1133_v59 = vpop.permute.xlu0 %1132  ;;  %v785_v23 = vrot.slane %v1742_v31, %v2078_v50 }
  0xbd   : > { %v1218_v10 = vsel %vm502_vm0, %v2052_v34, %v1133_v59  ;;  %v1221_v59 = vsel %vm502_vm0, %v2066_v43, %v1135_v49 }
  0xbe   : > { %v794_v8 = vcombine.high %v771_v61, %v785_v23  ;;  %v793_v6 = vcombine.low %v771_v61, %v785_v23 }
  0xc0   : > { %v1106_v54 = vpop.permute.xlu1 %1105  ;;  %981 = vmatprep.mubr.bf16.mxu0 %v794_v8  ;;  %v1137_v9 = vpop.permute.xlu0 %1136 }
  0xc1   : > { %982 = vmatmul.mubr.bf16.vlgmr.msra.gmra.mrb[0].mxu0 %v793_v6  ;;  %v1189_v16 = vsel %vm527_vm1, %v1187_v55, %v1106_v54  ;;  %v1224_v61 = vsel %vm502_vm0, %v2064_v42, %v1137_v9 }
  0xc2   : > { %1859 = vmatpush3.bf16.msra.mxu0 %v2243_v30 }
  0xc3   : > { %1860 = vmatprep.subr.bf16.mxu0 %v2289_v58 }
  0xc4   : > { %v1110_v18 = vpop.permute.xlu1 %1109  ;;  %v1108_v14 = vpop.permute.xlu0 %1107 }
  0xc5   : > { %v1191_v38 = vsel %vm527_vm1, %v2482_v25, %v1108_v14  ;;  %v1193_v34 = vsel %vm527_vm1, %v2478_v3, %v1110_v18 }
  0xc6   : > { %1861 = vmatpush3.bf16.msra.mxu0 %v2289_v58  ;;  %v1206_v25 = vsel %vm544_vm2, %v1191_v38, %v2492_v7  ;;  %v1207_v43 = vsel %vm544_vm2, %v1193_v34, %v2490_v52 }
  0xc8   : > { %v1147_v0 = vpop.permute.xlu1 %1146  ;;  %v1112_v56 = vpop.permute.xlu0 %1111 }
  0xc9   : > { %v1238_v45 = vsel %vm527_vm1, %v1215_v2, %v1147_v0  ;;  %v1195_v12 = vsel %vm527_vm1, %v2513_v37, %v1112_v56 }
  0xca   : > { %v1208_v37 = vsel %vm544_vm2, %v1195_v12, %v2525_v40  ;;  %v1331_v12 = vrot.slane %v2324_v33, %v2078_v50 }
  0xcc   : > { %v1151_v5 = vpop.permute.xlu1 %1150  ;;  %v1149_v19 = vpop.permute.xlu0 %1148 }
  0xcd   : > { %v1240_v60 = vsel %vm527_vm1, %v1218_v10, %v1149_v19  ;;  %v1242_v7 = vsel %vm527_vm1, %v1221_v59, %v1151_v5  ;;  %v2754_v59 = vld [vmem:[#allocation2_spill] sm:$0xff] }
  0xd0   : > { %v2544_v20 = vpop.permute.xlu1 %308  ;;  %v1153_v63 = vpop.permute.xlu0 %1152 }
  0xd1   : > { %v1244_v23 = vsel %vm527_vm1, %v1224_v61, %v1153_v63  ;;  %v517_v61 = vsel %vm502_vm0, %v2754_v59, %v2544_v20 }
  0xd4   : > { %v2546_v21 = vpop.permute.xlu1 %312  ;;  %v2548_v11 = vpop.permute.xlu0 %310 }
  0xd8   : > { %v2550_v13 = vpop.permute.xlu1 %446  ;;  %v2552_v30 = vpop.permute.xlu0 %314 }
  0xdc   : > { %v2554_v53 = vpop.permute.xlu1 %450  ;;  %v2556_v15 = vpop.permute.xlu0 %448 }
  0xdd   : > { %v2618_v33 = vsel %vm502_vm0, %v2348_v4, %v2556_v15 }
  0xe0   : > { %v1122_v58 = vpop.permute.xlu1 %1121  ;;  %v2558_v36 = vpop.permute.xlu0 %452 }
  0xe1   : > { %v1205_v17 = vsel %vm544_vm2, %v1189_v16, %v1122_v58 }
  0xe4   : > { %v1165_v62 = vpop.permute.xlu1 %1164  ;;  %v1163_v32 = vpop.permute.xlu0 %1162 }
  0xe5   : > { %v1256_v35 = vsel %vm544_vm2, %v1240_v60, %v1165_v62  ;;  %v1254_v1 = vsel %vm544_vm2, %v1238_v45, %v1163_v32  ;;  %v1181_v62 = vshll.u32 %v2426_v22, 16 }
  0xe6   : > { %v1301_v48 = vcombine.low %v1206_v25, %v1256_v35  ;;  %v1285_v31 = vcombine.low %v1205_v17, %v1254_v1  ;;  %v1179_v25 = vshrl.u32 %v2426_v22, 16  ;;  %v2756_v22 = vld [vmem:[#allocation7_spill] sm:$0xff] }
  0xe7   : > { %v1183_v35 = vrot.slane %v1181_v62, 1 }
  0xe8   : > { %v1308_v8 = vrot.slane %v1301_v48, %v2078_v50  ;;  %v1292_v6 = vrot.slane %v1285_v31, %v2078_v50  ;;  %v1169_v3 = vpop.permute.xlu1 %1168  ;;  %v1167_v54 = vpop.permute.xlu0 %1166  ;;  %v1347_v48 = vrot.slane %v2440_v24, %v2078_v50 }
  0xe9   : > { %v1260_v18 = vsel %vm544_vm2, %v1244_v23, %v1169_v3  ;;  %v1258_v42 = vsel %vm544_vm2, %v1242_v7, %v1167_v54  ;;  %v1184_v31 = vor.u32 %v1183_v35, %v1179_v25  ;;  %v2755_v7 = vld [vmem:[#allocation6_spill] sm:$0xff]  ;;  %v1379_v35 = vrot.slane %v2449_v44, %v2078_v50 }
  0xea   : > { %v1333_v49 = vcombine.low %v1208_v37, %v1260_v18  ;;  %v1317_v9 = vcombine.low %v1207_v43, %v1258_v42  ;;  %v1768_v14 = vcombine.low %v1292_v6, %v1308_v8  ;;  %v520_v23 = vsel %vm502_vm0, %v2755_v7, %v2548_v11  ;;  %v2757_v18 = vld [vmem:[#allocation5_spill] sm:$0xff]  ;;  %v2758_v42 = vld [vmem:[#allocation4_spill] sm:$0xff] }
  0xeb   : > { %v2613_v8 = vsel %vm502_vm0, %v2756_v22, %v2550_v13  ;;  %v523_v43 = vsel %vm502_vm0, %v2757_v18, %v2546_v21  ;;  %v1411_v25 = vrot.slane %v1184_v31, %v2078_v50 }
  0xec   : > { %v1340_v0 = vrot.slane %v1333_v49, %v2078_v50  ;;  %v1324_v56 = vrot.slane %v1317_v9, %v2078_v50  ;;  %v407_v5 = vpop.permute.xlu1 %406  ;;  %v405_v19 = vpop.permute.xlu0 %404  ;;  %v1423_v40 = vrot.slane %v1768_v14, %v2078_v50  ;;  %v526_v49 = vsel %vm502_vm0, %v2758_v42, %v2552_v30 }
  0xed   : > { %v539_v24 = vsel %vm527_vm1, %v520_v23, %v407_v5  ;;  %v537_v6 = vsel %vm527_vm1, %v517_v61, %v405_v19 }
  0xee   : > { %v1770_v63 = vcombine.low %v1324_v56, %v1340_v0  ;;  %v2645_v0 = vsel %vm502_vm0, %v2360_v51, %v2554_v53  ;;  %v584_v56 = vsel %vm502_vm0, %v2415_v57, %v2558_v36 }
  0xf0   : > { %v411_v58 = vpop.permute.xlu1 %410  ;;  %v409_v38 = vpop.permute.xlu0 %408  ;;  %v1437_v2 = vrot.slane %v1770_v63, %v2078_v50 }
  0xf1   : > { %v543_v5 = vsel %vm527_vm1, %v526_v49, %v411_v58  ;;  %v541_v19 = vsel %vm527_vm1, %v523_v43, %v409_v38  ;;  %v1771_v38 = vcombine.low %v1331_v12, %v1347_v48 }
  0xf2   : > { %v1446_v55 = vcombine.high %v1423_v40, %v1437_v2  ;;  %v1445_v52 = vcombine.low %v1423_v40, %v1437_v2 }
  0xf3   : > { %v1444_v48 = vrot.slane %v1771_v38, %v2078_v50 }
  0xf4   : > { %v468_v10 = vpop.permute.xlu1 %467  ;;  %1525 = vmatprep.mubr.bf16.mxu1 %v1446_v55  ;;  %v466_v16 = vpop.permute.xlu0 %465 }
  0xf5   : > { %1526 = vmatmul.mubr.bf16.vlgmr.msra.gmra.mrb[4].mxu1 %v1445_v52  ;;  %v596_v20 = vsel %vm527_vm1, %v2618_v33, %v468_v10  ;;  %v594_v11 = vsel %vm527_vm1, %v2613_v8, %v466_v16 }
  0xf8   : > { %v472_v45 = vpop.permute.xlu1 %471  ;;  %v470_v60 = vpop.permute.xlu0 %469 }
  0xf9   : > { %v600_v21 = vsel %vm527_vm1, %v584_v56, %v472_v45  ;;  %v598_v30 = vsel %vm527_vm1, %v2645_v0, %v470_v60 }
  0xfc   : > { %v426_v32 = vpop.permute.xlu1 %425  ;;  %v424_v17 = vpop.permute.xlu0 %423 }
  0xfd   : > { %v556_v13 = vsel %vm544_vm2, %v539_v24, %v426_v32  ;;  %v554_v37 = vsel %vm544_vm2, %v537_v6, %v424_v17  ;;  %v1363_v32 = vrot.slane %v2438_v46, %v2078_v50  ;;  %v1395_v17 = vrot.slane %v2447_v41, %v2078_v50 }
  0xff   : > { %v1775_v23 = vcombine.low %v1395_v17, %v1411_v25  ;;  %v1773_v22 = vcombine.low %v1363_v32, %v1379_v35 }
 0x100   : > { %v430_v1 = vpop.permute.xlu1 %429  ;;  %v428_v34 = vpop.permute.xlu0 %427 }
 0x101   : > { %v560_v53 = vsel %vm544_vm2, %v543_v5, %v430_v1  ;;  %v558_v57 = vsel %vm544_vm2, %v541_v19, %v428_v34  ;;  %v2759_v34 = vld [vmem:[#allocation3_spill] sm:$0xff] }
 0x102   : > { %v1430_v12 = vrot.slane %v2759_v34, %v2078_v50 }
 0x104   : > { %v2626_v3 = vpop.permute.xlu1 %489  ;;  %v2628_v54 = vpop.permute.xlu0 %487  ;;  %v1447_v31 = vcombine.low %v1430_v12, %v1444_v48 }
 0x105   : > { %v612_v4 = vsel %vm544_vm2, %v596_v20, %v2626_v3  ;;  %v610_v15 = vsel %vm544_vm2, %v594_v11, %v2628_v54  ;;  %v1479_v20 = vrot.slane %v1775_v23, %v2078_v50  ;;  %v1465_v11 = vrot.slane %v1773_v22, %v2078_v50 }
 0x106   : > { %v713_v9 = vcombine.low %v556_v13, %v612_v4  ;;  %v697_v14 = vcombine.low %v554_v37, %v610_v15 }
 0x107   : > { %v1482_v15 = vcombine.low %v1465_v11, %v1479_v20 }
 0x108   : > { %v720_v63 = vrot.slane %v713_v9, %v2078_v50  ;;  %v704_v40 = vrot.slane %v697_v14, %v2078_v50  ;;  %v494_v2 = vpop.permute.xlu1 %493  ;;  %v2657_v51 = vpop.permute.xlu0 %491 }
 0x109   : > { %v616_v36 = vsel %vm544_vm2, %v600_v21, %v494_v2  ;;  %v614_v58 = vsel %vm544_vm2, %v598_v30, %v2657_v51 }
 0x10a   : > { %v745_v55 = vcombine.low %v560_v53, %v616_v36  ;;  %v729_v52 = vcombine.low %v558_v57, %v614_v58  ;;  %v1744_v10 = vcombine.low %v704_v40, %v720_v63 }
 0x10c   : > { %v752_v16 = vrot.slane %v745_v55, %v2078_v50  ;;  %v736_v45 = vrot.slane %v729_v52, %v2078_v50  ;;  %v1141_v60 = vpop.permute.xlu1 %1140  ;;  %v1139_v62 = vpop.permute.xlu0 %1138  ;;  %v806_v7 = vrot.slane %v1744_v10, %v2078_v50 }
 0x10d   : > { %v1230_v21 = vsel %vm502_vm0, %v2237_v29, %v1141_v60  ;;  %v1227_v30 = vsel %vm502_vm0, %v2233_v26, %v1139_v62 }
 0x10e   : > { %v1746_v1 = vcombine.low %v736_v45, %v752_v16 }
 0x110   : > { %v1145_v59 = vpop.permute.xlu1 %1144  ;;  %v1143_v61 = vpop.permute.xlu0 %1142  ;;  %v820_v46 = vrot.slane %v1746_v1, %v2078_v50 }
 0x111   : > { %v1236_v55 = vsel %vm502_vm0, %v2214_v47, %v1145_v59 }
 0x112   : > { %v829_v41 = vcombine.high %v806_v7, %v820_v46  ;;  %v828_v24 = vcombine.low %v806_v7, %v820_v46 }
 0x114   : > { %v1116_v6 = vpop.permute.xlu1 %1115  ;;  %989 = vmatprep.mubr.bf16.mxu0 %v829_v41  ;;  %v1114_v44 = vpop.permute.xlu0 %1113 }
 0x115   : > { %990 = vmatmul.mubr.bf16.gmra.mrb[4].mxu0 %v828_v24  ;;  %v1199_v5 = vsel %vm527_vm1, %v2613_v8, %v1116_v6  ;;  %v1197_v19 = vsel %vm527_vm1, %v2509_v27, %v1114_v44 }
 0x116   : > { %1862 = vmatprep.mubr.msk.bf16.mxu0 %vm502_vm0, %v1447_v31  ;;  %v1210_v57 = vsel %vm544_vm2, %v1199_v5, %v2628_v54  ;;  %v1209_v27 = vsel %vm544_vm2, %v1197_v19, %v2523_v39  ;;  %v1233_v54 = vsel %vm502_vm0, %v2235_v28, %v1143_v61 }
 0x117   : > { %v2681_v13 = vpop.f32.mrb[0].mxu1 }
 0x118   : > { %v1120_v37 = vpop.permute.xlu1 %1119  ;;  %v1118_v4 = vpop.permute.xlu0 %1117 }
 0x119   : > { %v1032_v18 = vpop.f32.mrb[1].mxu1  ;;  %v1203_v29 = vsel %vm527_vm1, %v2645_v0, %v1120_v37  ;;  %v1201_v26 = vsel %vm527_vm1, %v2618_v33, %v1118_v4 }
 0x11a   : > { %v2683_v43 = vpop.f32.mrb[2].mxu1  ;;  %v1212_v33 = vsel %vm544_vm2, %v1203_v29, %v2657_v51  ;;  %v1211_v47 = vsel %vm544_vm2, %v1201_v26, %v2626_v3 }
 0x11b   : > { %v1035_v42 = vpop.f32.mrb[3].mxu1 }
 0x11c   : > { %v1157_v49 = vpop.permute.xlu1 %1156  ;;  %v1155_v9 = vpop.permute.xlu0 %1154 }
 0x11d   : > { %1863 = vmatmul.mubr.msk.bf16.vlgmr.msra.gmra.mrb[8].mxu0 %vm502_vm0, %v1482_v15  ;;  %v1248_v63 = vsel %vm527_vm1, %v1230_v21, %v1157_v49  ;;  %v1246_v40 = vsel %vm527_vm1, %v1227_v30, %v1155_v9  ;;  %v1778_v21 = vld [vmem:[%s2741_s3] ss:$0 sm:$0xff] }
 0x120   : > { %v1161_v14 = vpop.permute.xlu1 %1160  ;;  %v1159_v56 = vpop.permute.xlu0 %1158 }
 0x121   : > { %v1252_v52 = vsel %vm527_vm1, %v1236_v55, %v1161_v14  ;;  %v1250_v39 = vsel %vm527_vm1, %v1233_v54, %v1159_v56 }
 0x124   : > { %v1173_v2 = vpop.permute.xlu1 %1172  ;;  %v1171_v53 = vpop.permute.xlu0 %1170 }
 0x125   : > { %v1264_v8 = vsel %vm544_vm2, %v1248_v63, %v1173_v2  ;;  %v1262_v36 = vsel %vm544_vm2, %v1246_v40, %v1171_v53 }
 0x126   : > { %v1365_v58 = vcombine.low %v1210_v57, %v1264_v8  ;;  %v1349_v38 = vcombine.low %v1209_v27, %v1262_v36 }
 0x128   : > { %v1372_v10 = vrot.slane %v1365_v58, %v2078_v50  ;;  %v1356_v16 = vrot.slane %v1349_v38, %v2078_v50  ;;  %v1177_v0 = vpop.permute.xlu1 %1176  ;;  %v1175_v45 = vpop.permute.xlu0 %1174 }
 0x129   : > { %v1268_v60 = vsel %vm544_vm2, %v1252_v52, %v1177_v0  ;;  %v1266_v28 = vsel %vm544_vm2, %v1250_v39, %v1175_v45 }
 0x12a   : > { %v1397_v62 = vcombine.low %v1212_v33, %v1268_v60  ;;  %v1381_v32 = vcombine.low %v1211_v47, %v1266_v28  ;;  %v1772_v17 = vcombine.low %v1356_v16, %v1372_v10 }
 0x12c   : > { %v1404_v25 = vrot.slane %v1397_v62, %v2078_v50  ;;  %v1388_v35 = vrot.slane %v1381_v32, %v2078_v50  ;;  %v1458_v34 = vrot.slane %v1772_v17, %v2078_v50 }
 0x12e   : > { %v1774_v1 = vcombine.low %v1388_v35, %v1404_v25 }
 0x130   : > { %v1472_v12 = vrot.slane %v1774_v1, %v2078_v50 }
 0x132   : > { %v1481_v51 = vcombine.high %v1458_v34, %v1472_v12  ;;  %v1480_v48 = vcombine.low %v1458_v34, %v1472_v12 }
 0x134   : > { %1533 = vmatprep.mubr.bf16.mxu1 %v1481_v51 }
 0x135   : > { %1534 = vmatmul.mubr.bf16.gmra.mrb[8].mxu1 %v1480_v48 }
 0x194   : > { %v1802_v59 = vpop.f32.mrb[0].mxu0 }
 0x195   : > { %v1803_v3 = vpop.f32.mrb[1].mxu0 }
 0x196   : > { %v1804_v61 = vadd.f32 %v1803_v3, %v1802_v59  ;;  %v1805_v7 = vpop.f32.mrb[2].mxu0 }
 0x197   : > { %v1806_v46 = vpop.f32.mrb[3].mxu0 }
 0x198   : > { %v1807_v23 = vadd.f32 %v1806_v46, %v1805_v7  ;;  %v1033_v22 = vadd.f32 %v1804_v61, %v1032_v18 }
 0x19a   : > { %v1036_v41 = vadd.f32 %v1807_v23, %v1035_v42 }
 0x1c8   : > { %v1834_v24 = vpop.f32.mrb[4].mxu1 }
 0x1c9   : > { %v1835_v31 = vpop.f32.mrb[5].mxu1 }
 0x1ca   : > { %v1836_v6 = vadd.f32 %v1835_v31, %v1834_v24  ;;  %v1837_v44 = vpop.f32.mrb[6].mxu1 }
 0x1cb   : > { %v1838_v20 = vpop.f32.mrb[7].mxu1 }
 0x1cc   : > { %v1839_v11 = vadd.f32 %v1838_v20, %v1837_v44 }
 0x1e8   : > { %v1808_v37 = vpop.f32.mrb[4].mxu0 }
 0x1e9   : > { %v1809_v50 = vpop.f32.mrb[5].mxu0 }
 0x1ea   : > { %v1810_v4 = vadd.f32 %v1809_v50, %v1808_v37  ;;  %v1811_v15 = vpop.f32.mrb[6].mxu0 }
 0x1eb   : > { %v1812_v49 = vpop.f32.mrb[7].mxu0 }
 0x1ec   : > { %v1041_v9 = vadd.f32 %v2681_v13, %v1810_v4  ;;  %v1813_v14 = vadd.f32 %v1812_v49, %v1811_v15 }
 0x1ee   : > { %v1044_v56 = vadd.f32 %v2683_v43, %v1813_v14 }
 0x1f0   : > { %v1864_v5 = vpop.f32.mrb[8].mxu0 }
 0x1f1   : > { %v1576_v18 = vpop.f32.mrb[9].mxu0 }
 0x1f2   : > { %v1577_v42 = vadd.f32 %v1836_v6, %v1576_v18  ;;  %v1865_v19 = vpop.f32.mrb[10].mxu0 }
 0x1f3   : > { %v1579_v30 = vpop.f32.mrb[11].mxu0 }
 0x1f4   : > { %v1591_v63 = vmax.f32 %v1033_v22, %v1577_v42  ;;  %v1580_v40 = vadd.f32 %v1839_v11, %v1579_v30 }
 0x1f6   : > { %v1601_v2 = vadd.f32 %v1778_v21, %v1591_v63  ;;  %v1592_v53 = vmax.f32 %v1036_v41, %v1580_v40 }
 0x1f8   : > { %v1605_v57 = vmax.f32 %v1601_v2, 0.0  ;;  %v1602_v8 = vadd.f32 %v1778_v21, %v1592_v53 }
 0x1fa   : > { %v1613_v13 = vcombine.high %v1605_v57, %v1605_v57  ;;  %v1606_v27 = vmax.f32 %v1602_v8, 0.0 }
 0x1fc   : > { %v1614_v36 = vcombine.high %v1606_v27, %v1606_v27  ;;  %v1621_v43 = vmax.f32 %v1605_v57, %v1613_v13 }
 0x1fe   : > { %v1622_v29 = vmax.f32 %v1606_v27, %v1614_v36 }
 0x200   : > { %v1629_v26 = vcombine.low %v1621_v43, %v1622_v29 }
 0x202   : > { %v1784_v58 = vpack.c.bf16 %v1629_v26, %v1629_v26 }
 0x204   : > { %1642 = vst.msk [vmem:[%s217_s21] sm:$0xf] %vm1641_vm3, %v1784_v58 }
 0x208   : > { %v1840_v38 = vpop.f32.mrb[8].mxu1 }
 0x209   : > { %v1841_v55 = vpop.f32.mrb[9].mxu1 }
 0x20a   : > { %v1842_v54 = vadd.f32 %v1841_v55, %v1840_v38  ;;  %v1843_v52 = vpop.f32.mrb[10].mxu1 }
 0x20b   : > { %v1844_v39 = vpop.f32.mrb[11].mxu1 }
 0x20c   : > { %v1585_v10 = vadd.f32 %v1864_v5, %v1842_v54  ;;  %v1845_v16 = vadd.f32 %v1844_v39, %v1843_v52 }
 0x20e   : > { %v1593_v0 = vmax.f32 %v1041_v9, %v1585_v10  ;;  %v1588_v45 = vadd.f32 %v1865_v19, %v1845_v16 }
 0x210   : > { %v1603_v33 = vadd.f32 %v1778_v21, %v1593_v0  ;;  %v1594_v60 = vmax.f32 %v1044_v56, %v1588_v45 }
 0x212   : > { %v1607_v47 = vmax.f32 %v1603_v33, 0.0  ;;  %v1604_v28 = vadd.f32 %v1778_v21, %v1594_v60 }
 0x214   : > { %v1615_v62 = vcombine.high %v1607_v47, %v1607_v47  ;;  %v1608_v32 = vmax.f32 %v1604_v28, 0.0 }
 0x216   : > { %v1616_v17 = vcombine.high %v1608_v32, %v1608_v32  ;;  %v1623_v25 = vmax.f32 %v1607_v47, %v1615_v62 }
 0x218   : > { %v1624_v35 = vmax.f32 %v1608_v32, %v1616_v17 }
 0x21a   : > { %v1630_v1 = vcombine.low %v1623_v25, %v1624_v35 }
 0x21c   : > { %v1785_v34 = vpack.c.bf16 %v1630_v1, %v1630_v1 }
 0x21e   : > { %1643 = vst.msk [vmem:[%s217_s21 + $0x4] sm:$0xf] %vm1641_vm3, %v1785_v34 }
 0x21f PF: > { %s14_s15 = sadd.s32 1, %s1923_s15  }
 0x220   : > { %p11_p4 = scmp.ge.s32.totalorder %s14_s15, 4  }
 0x222   :  { %13 = sbr.rel (!%p11_p4) target bundleno = 1 (0x1), region = 69 }

// kernel: simple_cnn_forward.5
= control target key start
LH: loop header
LB: loop body
LE: loop exit
PB: predicated region body
PF: predicated region fallthrough
CT: control target
= control target key end

     0   :  { %v1033_v22 = vmov 1966171168   ;;  %v163_v24 = vlaneseq  ;;  %vm783_vm0 = vcmask 1041408   ;;  %vm801_vm1 = vcmask 1024   ;;  %s1285_s1 = inlined_call_operand.vmem [shape: bf16[1024,128], index: 1, kind: input, shape index: {}]   ;;  %s1286_s0 = inlined_call_operand.vmem [shape: bf16[2,1024], index: 0, kind: input, shape index: {}]   ;;  %s1287_s4 = inlined_call_operand.<no memory space> [shape: f32[1,1], index: 4, kind: input, shape index: {}]   ;;  %s1288_s2 = inlined_call_operand.vmem [shape: f32[1,128], index: 2, kind: input, shape index: {}]   ;;  %s1289_s3 = inlined_call_operand.vmem [shape: f32[1,128], index: 3, kind: input, shape index: {}]   ;;  %s1290_s5 = inlined_call_operand.vmem [shape: f32[2,1], index: 5, kind: output, shape index: {}]  }
   0x1   :  { %v964_v0 = vld [vmem:[%s1285_s1 + $0x40] sm:$0xff]   ;;  %v968_v4 = vld [vmem:[%s1285_s1 + $0x48] sm:$0xff]   ;;  %v972_v8 = vld [vmem:[%s1285_s1 + $0x50] sm:$0xff]   ;;  %v161_v23 = vunpack.c.l.s4 %v1033_v22 }
   0x2   :  { %v965_v1 = vld [vmem:[%s1285_s1 + $0xc0] sm:$0xff]   ;;  %874 = vmatprep.subr.bf16.mxu0 %v964_v0  ;;  %v969_v5 = vld [vmem:[%s1285_s1 + $0xc8] sm:$0xff]   ;;  %v973_v9 = vld [vmem:[%s1285_s1 + $0xd0] sm:$0xff]   ;;  %v164_v30 = vshrl.u32 %v163_v24, 7 }
   0x3   :  { %v966_v2 = vld [vmem:[%s1285_s1] sm:$0xff]   ;;  %896 = vmatprep.subr.bf16.mxu1 %v965_v1  ;;  %v970_v6 = vld [vmem:[%s1285_s1 + $0x8] sm:$0xff]   ;;  %v974_v10 = vld [vmem:[%s1285_s1 + $0x10] sm:$0xff]   ;;  %v162_v29 = vunpack.c.0.s8 %v161_v23 }
   0x4   :  { %v967_v3 = vld [vmem:[%s1285_s1 + $0x80] sm:$0xff]   ;;  %875 = vmatpush3.bf16.msra.mxu0 %v966_v2  ;;  %v971_v7 = vld [vmem:[%s1285_s1 + $0x88] sm:$0xff]   ;;  %v975_v11 = vld [vmem:[%s1285_s1 + $0x90] sm:$0xff]  }
   0x5   :  { %897 = vmatpush3.bf16.msra.mxu1 %v967_v3  ;;  %876 = vmatprep.subr.bf16.mxu0 %v968_v4  ;;  %v976_v12 = vld [vmem:[%s1285_s1 + $0x58] sm:$0xff]   ;;  %v980_v16 = vld [vmem:[%s1285_s1 + $0x60] sm:$0xff]   ;;  %v984_v20 = vld [vmem:[%s1285_s1 + $0x68] sm:$0xff]   ;;  %v1155_v35 = vsub.s32 %v162_v29, %v164_v30 }
   0x6   :  { %898 = vmatprep.subr.bf16.mxu1 %v969_v5  ;;  %v977_v13 = vld [vmem:[%s1285_s1 + $0xd8] sm:$0xff]   ;;  %v981_v17 = vld [vmem:[%s1285_s1 + $0xe0] sm:$0xff]   ;;  %v985_v21 = vld [vmem:[%s1285_s1 + $0xe8] sm:$0xff]  }
   0x7   :  { %v978_v14 = vld [vmem:[%s1285_s1 + $0x18] sm:$0xff]   ;;  %v982_v18 = vld [vmem:[%s1285_s1 + $0x20] sm:$0xff]   ;;  %v986_v25 = vld [vmem:[%s1285_s1 + $0x28] sm:$0xff]  }
   0x8   :  { %877 = vmatpush3.bf16.msra.mxu0 %v970_v6  ;;  %v979_v15 = vld [vmem:[%s1285_s1 + $0x98] sm:$0xff]   ;;  %v983_v19 = vld [vmem:[%s1285_s1 + $0xa0] sm:$0xff]   ;;  %v987_v26 = vld [vmem:[%s1285_s1 + $0xa8] sm:$0xff]  }
   0x9   :  { %899 = vmatpush3.bf16.msra.mxu1 %v971_v7  ;;  %878 = vmatprep.subr.bf16.mxu0 %v972_v8  ;;  %v988_v27 = vld [vmem:[%s1285_s1 + $0x70] sm:$0xff]   ;;  %v992_v33 = vld [vmem:[%s1285_s1 + $0x78] sm:$0xff]   ;;  %v29_v38 = vld [vmem:[%s1286_s0] sm:$0xff] }
   0xa   :  { %900 = vmatprep.subr.bf16.mxu1 %v973_v9  ;;  %v989_v28 = vld [vmem:[%s1285_s1 + $0xf0] sm:$0xff]   ;;  %v993_v34 = vld [vmem:[%s1285_s1 + $0xf8] sm:$0xff]   ;;  %v159_v39 = vcombine.high %v29_v38, %v29_v38  ;;  %v166_v40 = vrot.slane %v29_v38, %v1155_v35  ;;  %v997_v41 = vld [vmem:[%s1285_s1 + $0x140] sm:$0xff]  }
   0xb   :  { %v990_v31 = vld [vmem:[%s1285_s1 + $0x30] sm:$0xff]   ;;  %v994_v36 = vld [vmem:[%s1285_s1 + $0x38] sm:$0xff]   ;;  %v998_v42 = vld [vmem:[%s1285_s1 + $0x1c0] sm:$0xff]  }
   0xc   :  { %879 = vmatpush3.bf16.msra.mxu0 %v974_v10  ;;  %v991_v32 = vld [vmem:[%s1285_s1 + $0xb0] sm:$0xff]   ;;  %v995_v37 = vld [vmem:[%s1285_s1 + $0xb8] sm:$0xff]   ;;  %v174_v43 = vcombine.high %v166_v40, %v166_v40  ;;  %v182_v44 = vrot.slane %v166_v40, %v1155_v35  ;;  %v1175_v45 = vrot.slane %v159_v39, %v1155_v35  ;;  %v999_v47 = vld [vmem:[%s1285_s1 + $0x100] sm:$0xff]  }
   0xd   :  { %901 = vmatpush3.bf16.msra.mxu1 %v975_v11  ;;  %880 = vmatprep.subr.bf16.mxu0 %v976_v12  ;;  %v1001_v50 = vld [vmem:[%s1285_s1 + $0x148] sm:$0xff]   ;;  %v1000_v52 = vld [vmem:[%s1285_s1 + $0x180] sm:$0xff]   ;;  %v1005_v57 = vld [vmem:[%s1285_s1 + $0x150] sm:$0xff]  }
   0xe   :  { %902 = vmatprep.subr.bf16.mxu1 %v977_v13  ;;  %v196_v46 = vrot.slane %v174_v43, %v1155_v35  ;;  %v175_v48 = vcombine.high %v1175_v45, %v1175_v45  ;;  %v204_v49 = vcombine.high %v182_v44, %v182_v44  ;;  %v1002_v54 = vld [vmem:[%s1285_s1 + $0x1c8] sm:$0xff]   ;;  %v1006_v59 = vld [vmem:[%s1285_s1 + $0x1d0] sm:$0xff]   ;;  %v1009_v61 = vld [vmem:[%s1285_s1 + $0x158] sm:$0xff]  }
   0xf   :  { %v1003_v55 = vld [vmem:[%s1285_s1 + $0x108] sm:$0xff]   ;;  %v1007_v60 = vld [vmem:[%s1285_s1 + $0x110] sm:$0xff]   ;;  %v1010_v63 = vld [vmem:[%s1285_s1 + $0x1d8] sm:$0xff]  }
  0x10   :  { %881 = vmatpush3.bf16.msra.mxu0 %v978_v14  ;;  %632 = vmatprep.mubr.bf16.mxu0 %v196_v46  ;;  %v206_v51 = vcombine.high %v196_v46, %v196_v46  ;;  %v203_v53 = vrot.slane %v175_v48, %v1155_v35  ;;  %v1004_v58 = vld [vmem:[%s1285_s1 + $0x188] sm:$0xff]   ;;  %v1008_v62 = vld [vmem:[%s1285_s1 + $0x190] sm:$0xff]   ;;  %v1011_v0 = vld [vmem:[%s1285_s1 + $0x118] sm:$0xff]  }
  0x11   :  { %903 = vmatpush3.bf16.msra.mxu1 %v979_v15  ;;  %882 = vmatprep.subr.bf16.mxu0 %v980_v16  ;;  %v1013_v1 = vld [vmem:[%s1285_s1 + $0x160] sm:$0xff]   ;;  %v1012_v2 = vld [vmem:[%s1285_s1 + $0x198] sm:$0xff]   ;;  %v1017_v5 = vld [vmem:[%s1285_s1 + $0x168] sm:$0xff]  }
  0x12   :  { %904 = vmatprep.subr.bf16.mxu1 %v981_v17  ;;  %672 = vmatprep.mubr.bf16.mxu1 %v206_v51  ;;  %v207_v56 = vcombine.high %v203_v53, %v203_v53  ;;  %v1014_v3 = vld [vmem:[%s1285_s1 + $0x1e0] sm:$0xff]   ;;  %v1018_v7 = vld [vmem:[%s1285_s1 + $0x1e8] sm:$0xff]   ;;  %v1021_v9 = vld [vmem:[%s1285_s1 + $0x170] sm:$0xff]   ;;  %v189_v17 = vrot.slane %v1175_v45, %v1155_v35 }
  0x13   :  { %v1015_v4 = vld [vmem:[%s1285_s1 + $0x120] sm:$0xff]   ;;  %v1019_v8 = vld [vmem:[%s1285_s1 + $0x128] sm:$0xff]   ;;  %v1022_v11 = vld [vmem:[%s1285_s1 + $0x1f0] sm:$0xff]  }
  0x14   :  { %883 = vmatpush3.bf16.msra.mxu0 %v982_v18  ;;  %v1016_v6 = vld [vmem:[%s1285_s1 + $0x1a0] sm:$0xff]   ;;  %v1020_v10 = vld [vmem:[%s1285_s1 + $0x1a8] sm:$0xff]   ;;  %v1023_v12 = vld [vmem:[%s1285_s1 + $0x130] sm:$0xff]  }
  0x15   :  { %905 = vmatpush3.bf16.msra.mxu1 %v983_v19  ;;  %884 = vmatprep.subr.bf16.mxu0 %v984_v20  ;;  %v1025_v13 = vld [vmem:[%s1285_s1 + $0x178] sm:$0xff]   ;;  %v1024_v14 = vld [vmem:[%s1285_s1 + $0x1b0] sm:$0xff]   ;;  %v205_v19 = vcombine.high %v189_v17, %v189_v17  ;;  %v1034_v20 = vmov 0.0  }
  0x16   :  { %906 = vmatprep.subr.bf16.mxu1 %v985_v21  ;;  %v1026_v15 = vld [vmem:[%s1285_s1 + $0x1f8] sm:$0xff]   ;;  %27 = vst [vmem:[#allocation2] sm:$0x3] %v1034_v20  ;;  %v10_v21 = vstv %s1287_s4 }
  0x17   :  { %v1027_v16 = vld [vmem:[%s1285_s1 + $0x138] sm:$0xff]   ;;  %11 = vst [vmem:[#allocation3] sm:$0x1] %v10_v21 }
  0x18   :  { %885 = vmatpush3.bf16.msra.mxu0 %v986_v25  ;;  %v1028_v18 = vld [vmem:[%s1285_s1 + $0x1b8] sm:$0xff]  }
  0x19   :  { %907 = vmatpush3.bf16.msra.mxu1 %v987_v26  ;;  %886 = vmatprep.subr.bf16.mxu0 %v988_v27 }
  0x1a   :  { %908 = vmatprep.subr.bf16.mxu1 %v989_v28 }
  0x1c   :  { %887 = vmatpush3.bf16.msra.mxu0 %v990_v31 }
  0x1d   :  { %909 = vmatpush3.bf16.msra.mxu1 %v991_v32  ;;  %888 = vmatprep.subr.bf16.mxu0 %v992_v33  ;;  %v28_v43 = vld [vmem:[#allocation2] sm:$0x3] }
  0x1e   :  { %910 = vmatprep.subr.bf16.mxu1 %v993_v34 }
  0x20   :  { %889 = vmatpush3.bf16.msra.mxu0 %v994_v36 }
  0x21   :  { %911 = vmatpush3.bf16.msra.mxu1 %v995_v37  ;;  %918 = vmatprep.subr.bf16.mxu0 %v997_v41 }
  0x22   :  { %940 = vmatprep.subr.bf16.mxu1 %v998_v42 }
  0x23   :  { %633 = vmatmul.mubr.bf16.vlgmr.msra.gmra.mrb[0].mxu0 %v182_v44 }
  0x24   :  { %919 = vmatpush3.bf16.msra.mxu0 %v999_v47  ;;  %673 = vmatmul.mubr.bf16.vlgmr.msra.gmra.mrb[0].mxu1 %v204_v49  ;;  %v871_v47 = vld [vmem:[%s1288_s2] ss:$0 sm:$0xff] }
  0x25   :  { %920 = vmatprep.subr.bf16.mxu0 %v1001_v50  ;;  %941 = vmatpush3.bf16.msra.mxu1 %v1000_v52  ;;  %v872_v50 = vld [vmem:[%s1289_s3] ss:$0 sm:$0xff] }
  0x26   :  { %712 = vmatprep.mubr.bf16.mxu0 %v203_v53  ;;  %942 = vmatprep.subr.bf16.mxu1 %v1002_v54  ;;  %v873_v54 = vld [vmem:[#allocation3] ss:$0 sm:$0xff] }
  0x27   :  { %752 = vmatprep.mubr.bf16.mxu1 %v207_v56 }
  0x28   :  { %921 = vmatpush3.bf16.msra.mxu0 %v1003_v55 }
  0x29   :  { %922 = vmatprep.subr.bf16.mxu0 %v1005_v57  ;;  %943 = vmatpush3.bf16.msra.mxu1 %v1004_v58 }
  0x2a   :  { %944 = vmatprep.subr.bf16.mxu1 %v1006_v59 }
  0x2c   :  { %923 = vmatpush3.bf16.msra.mxu0 %v1007_v60 }
  0x2d   :  { %924 = vmatprep.subr.bf16.mxu0 %v1009_v61  ;;  %945 = vmatpush3.bf16.msra.mxu1 %v1008_v62 }
  0x2e   :  { %946 = vmatprep.subr.bf16.mxu1 %v1010_v63 }
  0x30   :  { %925 = vmatpush3.bf16.msra.mxu0 %v1011_v0 }
  0x31   :  { %926 = vmatprep.subr.bf16.mxu0 %v1013_v1  ;;  %947 = vmatpush3.bf16.msra.mxu1 %v1012_v2 }
  0x32   :  { %948 = vmatprep.subr.bf16.mxu1 %v1014_v3 }
  0x34   :  { %927 = vmatpush3.bf16.msra.mxu0 %v1015_v4 }
  0x35   :  { %928 = vmatprep.subr.bf16.mxu0 %v1017_v5  ;;  %949 = vmatpush3.bf16.msra.mxu1 %v1016_v6 }
  0x36   :  { %950 = vmatprep.subr.bf16.mxu1 %v1018_v7 }
  0x38   :  { %929 = vmatpush3.bf16.msra.mxu0 %v1019_v8 }
  0x39   :  { %930 = vmatprep.subr.bf16.mxu0 %v1021_v9  ;;  %951 = vmatpush3.bf16.msra.mxu1 %v1020_v10 }
  0x3a   :  { %952 = vmatprep.subr.bf16.mxu1 %v1022_v11 }
  0x3c   :  { %931 = vmatpush3.bf16.msra.mxu0 %v1023_v12 }
  0x3d   :  { %932 = vmatprep.subr.bf16.mxu0 %v1025_v13  ;;  %953 = vmatpush3.bf16.msra.mxu1 %v1024_v14 }
  0x3e   :  { %954 = vmatprep.subr.bf16.mxu1 %v1026_v15 }
  0x40   :  { %933 = vmatpush3.bf16.msra.mxu0 %v1027_v16 }
  0x41   :  { %955 = vmatpush3.bf16.msra.mxu1 %v1028_v18 }
  0x43   :  { %713 = vmatmul.mubr.bf16.vlgmr.msra.gmra.mrb[4].mxu0 %v189_v17 }
  0x44   :  { %753 = vmatmul.mubr.bf16.vlgmr.msra.gmra.mrb[4].mxu1 %v205_v19 }
  0xf6   :  { %v890_v22 = vpop.f32.mrb[0].mxu0 }
  0xf7   :  { %v891_v23 = vpop.f32.mrb[1].mxu0  ;;  %v912_v24 = vpop.f32.mrb[0].mxu1 }
  0xf8   :  { %v892_v25 = vadd.f32 %v891_v23, %v890_v22  ;;  %v893_v26 = vpop.f32.mrb[2].mxu0  ;;  %v913_v27 = vpop.f32.mrb[1].mxu1 }
  0xf9   :  { %v894_v28 = vpop.f32.mrb[3].mxu0  ;;  %v914_v29 = vadd.f32 %v913_v27, %v912_v24  ;;  %v915_v30 = vpop.f32.mrb[2].mxu1 }
  0xfa   :  { %v916_v31 = vpop.f32.mrb[3].mxu1 }
  0xfb   :  { %v675_v32 = vadd.f32 %v914_v29, %v892_v25 }
 0x116   :  { %v934_v33 = vpop.f32.mrb[4].mxu0 }
 0x117   :  { %v935_v34 = vpop.f32.mrb[5].mxu0  ;;  %v956_v35 = vpop.f32.mrb[4].mxu1 }
 0x118   :  { %v936_v36 = vadd.f32 %v935_v34, %v934_v33  ;;  %v937_v37 = vpop.f32.mrb[6].mxu0  ;;  %v957_v38 = vpop.f32.mrb[5].mxu1 }
 0x119   :  { %v938_v39 = vpop.f32.mrb[7].mxu0  ;;  %v958_v41 = vadd.f32 %v957_v38, %v956_v35  ;;  %v959_v42 = vpop.f32.mrb[6].mxu1 }
 0x11a   :  { %v715_v40 = vadd.f32 %v936_v36, %v675_v32  ;;  %v960_v44 = vpop.f32.mrb[7].mxu1 }
 0x11c   :  { %v755_v45 = vadd.f32 %v958_v41, %v715_v40 }
 0x11e   :  { %v760_v46 = vadd.f32 %v755_v45, %v28_v43 }
 0x120   :  { %761 = vst [vmem:[#allocation2] sm:$0x3] %v760_v46 }
 0x127   :  { %v765_v48 = vld [vmem:[#allocation2] sm:$0x3] }
 0x128   :  { %v773_v49 = vadd.f32 %v871_v47, %v765_v48 }
 0x12a   :  { %v774_v51 = vmax.f32 %v773_v49, 0.0 }
 0x12c   :  { %v782_v52 = vmul.f32 %v872_v50, %v774_v51 }
 0x12e   :  { %v784_v53 = vsel %vm783_vm0, %v782_v52, 0.0 }
 0x12f   :  { %785 = vadd.xlane.f32.xlu0 %v784_v53 }
 0x1bc   :  { %v786_v55 = vpop.xlane.xlu0 %785 }
 0x1bd   :  { %v794_v56 = vadd.f32 %v873_v54, %v786_v55 }
 0x1bf   :  { %v795_v57 = vsub.f32 0.0, %v794_v56 }
 0x1c1   :  { %v796_v58 = vmul.f32 1.442695, %v795_v57 }
 0x1c3   :  { %1029 = vpow2.f32 %v796_v58 }
 0x1cd   :  { %v1030_v59 = vpop.eup %1029 }
 0x1ce   :  { %v798_v60 = vadd.f32 1.0, %v1030_v59 }
 0x1d0   :  { %1031 = vrcp.f32 %v798_v60 }
 0x1da   :  { %v1032_v61 = vpop.eup %1031 }
 0x1db   :  { %802 = vst.msk [vmem:[%s1290_s5] sm:$0x3] %vm801_vm1, %v1032_v61 }

</bundles_post_ra>
